<compile_context>
chip_gen: v6e
topology: v6e:2x2x1
jax: 0.10.0
libtpu: 0.0.40
codegen_flags: <defaults>
</compile_context>

<pallas_src>
import jax
import jax.numpy as jnp
from jax.experimental import pallas as pl
from jax.experimental.pallas import tpu as pltpu

KH = KW = 3  # kernel_size = 3, padding = 1


# ---------------------------------------------------------------------------
# Kernel bodies
# ---------------------------------------------------------------------------

def _im2col_matmul(xf, w_ref, b_ref, out_ref):
    """xf: (TH+2, W+2, Cin) f32 padded window. Writes out_ref[0] = (TH, W, Cout)."""
    TH = out_ref.shape[1]
    W = out_ref.shape[2]
    Cout = out_ref.shape[3]
    Cin = xf.shape[-1]

    # 9 shifted taps (kh-major, kw-minor) concatenated on the channel axis
    # FIRST, then a single reshape to the matmul operand (one relayout, not 9).
    taps = [xf[kh:kh + TH, kw:kw + W, :] for kh in range(KH) for kw in range(KW)]
    patches = jnp.concatenate(taps, axis=-1).reshape(TH * W, KH * KW * Cin)

    y = jnp.dot(patches, w_ref[...].astype(jnp.float32),
                preferred_element_type=jnp.float32)           # (TH*W, Cout)
    y = y + b_ref[0].astype(jnp.float32)
    out_ref[0] = y.reshape(TH, W, Cout).astype(out_ref.dtype)


def _dwsep_kernel_full(x_ref, w_ref, b_ref, out_ref):
    """Fast path: whole padded image per grid step.

    x_ref   : (1, H+2, W+2, Cin)
    w_ref   : (9*Cin, Cout), b_ref: (1, Cout)
    out_ref : (1, H, W, Cout)
    """
    _im2col_matmul(x_ref[0].astype(jnp.float32), w_ref, b_ref, out_ref)


def _dwsep_kernel_tiled(xm_ref, xh_ref, w_ref, b_ref, out_ref):
    """Tiled path (even TH): main TH rows + ONE merged 2-row halo block.

    xm_ref : (1, TH, W+2, Cin)   rows [i*TH, i*TH+TH) of the padded image
    xh_ref : (1, 2,  W+2, Cin)   rows i*TH+TH, i*TH+TH+1
    """
    xf = jnp.concatenate([xm_ref[0], xh_ref[0]], axis=0).astype(jnp.float32)
    _im2col_matmul(xf, w_ref, b_ref, out_ref)


def _dwsep_kernel_tiled_2halo(xm_ref, xh0_ref, xh1_ref, w_ref, b_ref, out_ref):
    """Tiled fallback (odd TH): two 1-row halo blocks."""
    xf = jnp.concatenate([xm_ref[0], xh0_ref[0], xh1_ref[0]],
                         axis=0).astype(jnp.float32)
    _im2col_matmul(xf, w_ref, b_ref, out_ref)


# ---------------------------------------------------------------------------
# VMEM budgeting / tile selection
# ---------------------------------------------------------------------------

def _round_up(x, m):
    return (x + m - 1) // m * m


def _padded_bytes(shape, itemsize):
    """Bytes a buffer actually occupies in VMEM: last dim rounds to 128 lanes,
    second-to-last to the dtype's sublane multiple (8 for f32, 16 for bf16)."""
    s = list(shape)
    s[-1] = _round_up(s[-1], 128)
    if len(s) >= 2:
        s[-2] = _round_up(s[-2], max(1, 32 // itemsize))
    n = 1
    for d in s:
        n *= d
    return n * itemsize


def _vmem_budget_bytes():
    """Generation-aware budget: ~60% of physical VMEM, capped at 96 MiB.
    (~76 MiB on v5e/v6e's 128 MiB parts, ~38 MiB on v7x's 64 MiB/TC)."""
    cap = 64 * 1024 * 1024
    try:
        cap = int(pltpu.get_tpu_info().vmem_capacity_bytes)
    except Exception:
        pass
    return max(32 * 1024 * 1024, min(int(cap * 0.6), 96 * 1024 * 1024))


def _weights_bytes(Cin, Cout, itemsize):
    return 2 * (_padded_bytes((KH * KW * Cin, Cout), itemsize)
                + _padded_bytes((1, Cout), itemsize))


def _tmp_bytes(rows, W, Cin, Cout):
    """f32 in-kernel temporaries for a (rows-2)-row output tile."""
    TH = rows - 2
    return (_padded_bytes((rows, W + 2, Cin), 4)                  # window copy
            + 2 * _padded_bytes((TH * W, KH * KW * Cin), 4)       # taps + im2col
            + 2 * _padded_bytes((TH * W, Cout), 4))               # result + cast


def _full_path_bytes(H, W, Cin, Cout, itemsize):
    return (2 * _padded_bytes((H + 2, W + 2, Cin), itemsize)      # input (2x buf)
            + 2 * _padded_bytes((H, W, Cout), itemsize)           # output (2x buf)
            + _weights_bytes(Cin, Cout, itemsize)
            + _tmp_bytes(H + 2, W, Cin, Cout))


def _tiled_bytes(TH, W, Cin, Cout, itemsize):
    Wp = W + 2
    return (2 * _padded_bytes((TH, Wp, Cin), itemsize)            # main rows
            + 2 * _padded_bytes((2, Wp, Cin), itemsize)           # halo rows
            + 2 * _padded_bytes((TH, W, Cout), itemsize)          # output
            + _weights_bytes(Cin, Cout, itemsize)
            + _tmp_bytes(TH + 2, W, Cin, Cout))


def _pick_tile_h(H, W, Cin, Cout, itemsize, budget):
    """Largest TH dividing H whose per-step footprint fits the budget.
    Even TH preferred (single merged 2-row halo); odd TH falls back to two
    1-row halo blocks."""
    divisors = sorted((d for d in range(1, H + 1) if H % d == 0), reverse=True)
    for th in (d for d in divisors if d % 2 == 0):
        if _tiled_bytes(th, W, Cin, Cout, itemsize) <= budget:
            return th, True
    for th in (d for d in divisors if d % 2 == 1):
        if _tiled_bytes(th, W, Cin, Cout, itemsize) <= budget:
            return th, False
    # TODO(synk): ragged (cdiv-based) last tile for awkward H; degrade to TH=1.
    return 1, False


# ---------------------------------------------------------------------------
# Public wrapper (PyTorch NCHW convention)
# ---------------------------------------------------------------------------

def depthwise_separable_conv(x_nchw, dw_w, dw_b, pw_w, pw_b):
    """x_nchw: (N, Cin, H, W). PyTorch parameter layouts:
       dw_w: (Cin, 1, KH, KW), dw_b: (Cin,), pw_w: (Cout, Cin, 1, 1), pw_b: (Cout,)
    Returns (N, Cout, H, W)."""
    N, Cin, H, W = x_nchw.shape
    Cout = pw_w.shape[0]

    # ---- glue: NCHW -> NHWC (channels on lanes) + spatial zero pad ----
    # TODO(synk): if the surrounding model is NHWC these transposes vanish.
    x_nhwc = jnp.transpose(x_nchw, (0, 2, 3, 1))
    x_pad = jnp.pad(x_nhwc, ((0, 0), (1, 1), (1, 1), (0, 0)))    # (N, H+2, W+2, Cin)

    # ---- fold depthwise into pointwise (im2col weight layout) ----
    dw_k = jnp.transpose(dw_w[:, 0, :, :], (1, 2, 0))            # (KH, KW, Cin)
    pw_k = jnp.transpose(pw_w[:, :, 0, 0], (1, 0))               # (Cin, Cout)
    w_eff = (dw_k[:, :, :, None] * pw_k[None, None, :, :]).reshape(KH * KW * Cin, Cout)
    b_eff = (dw_b @ pw_k + pw_b).reshape(1, Cout)

    itemsize = jnp.dtype(x_nchw.dtype).itemsize
    budget = _vmem_budget_bytes()
    out_shape = jax.ShapeDtypeStruct((N, H, W, Cout), x_nchw.dtype)
    Wp = W + 2

    if _full_path_bytes(H, W, Cin, Cout, itemsize) <= budget:
        # -------- fast path: whole image per grid step, grid = (N,) --------
        out_nhwc = pl.pallas_call(
            _dwsep_kernel_full,
            out_shape=out_shape,
            grid_spec=pltpu.PrefetchScalarGridSpec(
                num_scalar_prefetch=0,
                grid=(N,),
                in_specs=[
                    pl.BlockSpec((1, H + 2, Wp, Cin), lambda n: (n, 0, 0, 0)),
                    pl.BlockSpec((KH * KW * Cin, Cout), lambda n: (0, 0)),
                    pl.BlockSpec((1, Cout), lambda n: (0, 0)),
                ],
                out_specs=pl.BlockSpec((1, H, W, Cout), lambda n: (n, 0, 0, 0)),
            ),
            compiler_params=pltpu.CompilerParams(
                dimension_semantics=("parallel",),
                vmem_limit_bytes=budget,
            ),
        )(x_pad, w_eff, b_eff)
    else:
        # -------- tiled path: H tiling with a halo, grid = (N, H//TH) --------
        TH, merged_halo = _pick_tile_h(H, W, Cin, Cout, itemsize, budget)
        nH = H // TH

        main_spec = pl.BlockSpec((1, TH, Wp, Cin), lambda n, i: (n, i, 0, 0))
        w_spec = pl.BlockSpec((KH * KW * Cin, Cout), lambda n, i: (0, 0))
        b_spec = pl.BlockSpec((1, Cout), lambda n, i: (0, 0))
        out_spec = pl.BlockSpec((1, TH, W, Cout), lambda n, i: (n, i, 0, 0))

        if merged_halo:
            kernel = _dwsep_kernel_tiled
            halo_specs = [pl.BlockSpec((1, 2, Wp, Cin),
                                       lambda n, i: (n, (i + 1) * TH // 2, 0, 0))]
            halo_args = (x_pad,)
        else:
            kernel = _dwsep_kernel_tiled_2halo
            halo_specs = [
                pl.BlockSpec((1, 1, Wp, Cin), lambda n, i: (n, (i + 1) * TH, 0, 0)),
                pl.BlockSpec((1, 1, Wp, Cin), lambda n, i: (n, (i + 1) * TH + 1, 0, 0)),
            ]
            halo_args = (x_pad, x_pad)

        out_nhwc = pl.pallas_call(
            kernel,
            out_shape=out_shape,
            grid_spec=pltpu.PrefetchScalarGridSpec(
                num_scalar_prefetch=0,
                grid=(N, nH),
                in_specs=[main_spec, *halo_specs, w_spec, b_spec],
                out_specs=out_spec,
            ),
            compiler_params=pltpu.CompilerParams(
                dimension_semantics=("parallel", "parallel"),
                vmem_limit_bytes=budget,
            ),
        )(x_pad, *halo_args, w_eff, b_eff)

    return jnp.transpose(out_nhwc, (0, 3, 1, 2))


# ---------------------------------------------------------------------------
# Reference + test
# ---------------------------------------------------------------------------

def _reference(x_nchw, dw_w, dw_b, pw_w, pw_b):
    """Plain-JAX reference (lax conv) for sanity checking."""
    Cin = x_nchw.shape[1]
    dn = jax.lax.conv_dimension_numbers(x_nchw.shape, dw_w.shape,
                                        ("NCHW", "OIHW", "NCHW"))
    y = jax.lax.conv_general_dilated(
        x_nchw, dw_w, window_strides=(1, 1), padding=((1, 1), (1, 1)),
        dimension_numbers=dn, feature_group_count=Cin)
    y = y + dw_b.reshape(1, -1, 1, 1)
    dn2 = jax.lax.conv_dimension_numbers(y.shape, pw_w.shape,
                                         ("NCHW", "OIHW", "NCHW"))
    z = jax.lax.conv_general_dilated(
        y, pw_w, window_strides=(1, 1), padding=((0, 0), (0, 0)),
        dimension_numbers=dn2)
    return z + pw_b.reshape(1, -1, 1, 1)


if __name__ == "__main__":
    N, Cin, Cout, H, W = 2, 4, 8, 16, 16

    key = jax.random.PRNGKey(0)
    kx, k1, k2, k3, k4 = jax.random.split(key, 5)

    x = jax.random.normal(kx, (N, Cin, H, W), dtype=jnp.float32)
    # PyTorch Conv2d parameter shapes, deterministic init.
    dw_w = jax.random.normal(k1, (Cin, 1, KH, KW), dtype=jnp.float32) * 0.1
    dw_b = jax.random.normal(k2, (Cin,), dtype=jnp.float32) * 0.1
    pw_w = jax.random.normal(k3, (Cout, Cin, 1, 1), dtype=jnp.float32) * 0.1
    pw_b = jax.random.normal(k4, (Cout,), dtype=jnp.float32) * 0.1

    out = depthwise_separable_conv(x, dw_w, dw_b, pw_w, pw_b)
    out = jax.block_until_ready(out)

    ref = _reference(x, dw_w, dw_b, pw_w, pw_b)
    assert out.shape == (N, Cout, H, W)
    assert jnp.allclose(out, ref, atol=1e-4, rtol=1e-4), "mismatch vs reference"

    print("KERNEL_OK")
</pallas_src>

<mosaic_0001>
module attributes {stable_mosaic.version = 11 : i64} {
  func.func @_dwsep_kernel_full(%arg0: i32, %arg1: memref<1x18x18x4xf32, #tpu.memory_space<vmem>>, %arg2: memref<36x8xf32, #tpu.memory_space<vmem>>, %arg3: memref<1x8xf32, #tpu.memory_space<vmem>>, %arg4: memref<1x16x16x8xf32, #tpu.memory_space<vmem>>) attributes {dimension_semantics = [#tpu.dimension_semantics<parallel>], iteration_bounds = array<i64: 2>, scalar_prefetch = 0 : i64, scratch_operands = 0 : i64, tpu.core_type = #tpu.core_type<tc>, window_params = [{transform_indices = @transform_0, window_bounds = array<i64: 1, 18, 18, 4>}, {pipeline_mode = #tpu.pipeline_mode<synchronous>, transform_indices = @transform_1, window_bounds = array<i64: 36, 8>}, {pipeline_mode = #tpu.pipeline_mode<synchronous>, transform_indices = @transform_2, window_bounds = array<i64: 1, 8>}, {transform_indices = @transform_3, window_bounds = array<i64: 1, 16, 16, 8>}]} {
    %c0 = arith.constant 0 : index
    %c0_0 = arith.constant 0 : index
    %c0_1 = arith.constant 0 : index
    %c0_2 = arith.constant 0 : index
    %0 = vector.load %arg1[%c0, %c0_0, %c0_1, %c0_2] : memref<1x18x18x4xf32, #tpu.memory_space<vmem>>, vector<1x18x18x4xf32>
    %1 = vector.shape_cast %0 : vector<1x18x18x4xf32> to vector<18x18x4xf32>
    %2 = vector.extract_strided_slice %1 {offsets = [0, 0, 0], sizes = [16, 16, 4], strides = [1, 1, 1]} : vector<18x18x4xf32> to vector<16x16x4xf32>
    %3 = vector.extract_strided_slice %1 {offsets = [0, 1, 0], sizes = [16, 16, 4], strides = [1, 1, 1]} : vector<18x18x4xf32> to vector<16x16x4xf32>
    %4 = vector.extract_strided_slice %1 {offsets = [0, 2, 0], sizes = [16, 16, 4], strides = [1, 1, 1]} : vector<18x18x4xf32> to vector<16x16x4xf32>
    %5 = vector.extract_strided_slice %1 {offsets = [1, 0, 0], sizes = [16, 16, 4], strides = [1, 1, 1]} : vector<18x18x4xf32> to vector<16x16x4xf32>
    %6 = vector.extract_strided_slice %1 {offsets = [1, 1, 0], sizes = [16, 16, 4], strides = [1, 1, 1]} : vector<18x18x4xf32> to vector<16x16x4xf32>
    %7 = vector.extract_strided_slice %1 {offsets = [1, 2, 0], sizes = [16, 16, 4], strides = [1, 1, 1]} : vector<18x18x4xf32> to vector<16x16x4xf32>
    %8 = vector.extract_strided_slice %1 {offsets = [2, 0, 0], sizes = [16, 16, 4], strides = [1, 1, 1]} : vector<18x18x4xf32> to vector<16x16x4xf32>
    %9 = vector.extract_strided_slice %1 {offsets = [2, 1, 0], sizes = [16, 16, 4], strides = [1, 1, 1]} : vector<18x18x4xf32> to vector<16x16x4xf32>
    %10 = vector.extract_strided_slice %1 {offsets = [2, 2, 0], sizes = [16, 16, 4], strides = [1, 1, 1]} : vector<18x18x4xf32> to vector<16x16x4xf32>
    %11 = tpu.concatenate %2, %3, %4, %5, %6, %7, %8, %9, %10 in 2 : vector<16x16x4xf32>, vector<16x16x4xf32>, vector<16x16x4xf32>, vector<16x16x4xf32>, vector<16x16x4xf32>, vector<16x16x4xf32>, vector<16x16x4xf32>, vector<16x16x4xf32>, vector<16x16x4xf32> -> vector<16x16x36xf32>
    %12 = vector.shape_cast %11 : vector<16x16x36xf32> to vector<256x36xf32>
    %c0_3 = arith.constant 0 : index
    %c0_4 = arith.constant 0 : index
    %13 = vector.load %arg2[%c0_3, %c0_4] : memref<36x8xf32, #tpu.memory_space<vmem>>, vector<36x8xf32>
    %cst = arith.constant dense<0.000000e+00> : vector<256x8xf32>
    %14 = tpu.matmul %12, %13, %cst {dimension_numbers = #tpu.dot_dimension_numbers<[1], [0], [0], [1], [0, 0, 1, 1], [], []>} : vector<256x36xf32>, vector<36x8xf32>, vector<256x8xf32> -> vector<256x8xf32>
    %c0_5 = arith.constant 0 : index
    %c0_6 = arith.constant 0 : index
    %15 = vector.load %arg3[%c0_5, %c0_6] : memref<1x8xf32, #tpu.memory_space<vmem>>, vector<1x8xf32>
    %16 = vector.shape_cast %15 : vector<1x8xf32> to vector<8xf32>
    %17 = vector.shape_cast %16 : vector<8xf32> to vector<1x8xf32>
    %18 = vector.broadcast %17 : vector<1x8xf32> to vector<256x8xf32>
    %19 = arith.addf %14, %18 : vector<256x8xf32>
    %20 = vector.shape_cast %19 : vector<256x8xf32> to vector<16x16x8xf32>
    %c0_7 = arith.constant 0 : index
    %c0_8 = arith.constant 0 : index
    %c0_9 = arith.constant 0 : index
    %c0_10 = arith.constant 0 : index
    %21 = vector.load %arg4[%c0_7, %c0_8, %c0_9, %c0_10] : memref<1x16x16x8xf32, #tpu.memory_space<vmem>>, vector<1x16x16x8xf32>
    %22 = vector.shape_cast %21 : vector<1x16x16x8xf32> to vector<16x16x8xf32>
    %23 = vector.shape_cast %20 : vector<16x16x8xf32> to vector<1x16x16x8xf32>
    tpu.vector_store %arg4[%c0_7, %c0_8, %c0_9, %c0_10], %23 {strides = array<i32>} : memref<1x16x16x8xf32, #tpu.memory_space<vmem>>, vector<1x16x16x8xf32>,
    return
  }
  func.func @transform_0(%arg0: i32) -> (i32, i32, i32, i32) {
    %c0_i32 = arith.constant 0 : i32
    %c0_i32_0 = arith.constant 0 : i32
    %c0_i32_1 = arith.constant 0 : i32
    %c0_i32_2 = arith.constant 0 : i32
    return %arg0, %c0_i32, %c0_i32_0, %c0_i32_1 : i32, i32, i32, i32
  }
  func.func @transform_1(%arg0: i32) -> (i32, i32) {
    %c0_i32 = arith.constant 0 : i32
    %c0_i32_0 = arith.constant 0 : i32
    %c0_i32_1 = arith.constant 0 : i32
    return %c0_i32, %c0_i32_0 : i32, i32
  }
  func.func @transform_2(%arg0: i32) -> (i32, i32) {
    %c0_i32 = arith.constant 0 : i32
    %c0_i32_0 = arith.constant 0 : i32
    %c0_i32_1 = arith.constant 0 : i32
    return %c0_i32, %c0_i32_0 : i32, i32
  }
  func.func @transform_3(%arg0: i32) -> (i32, i32, i32, i32) {
    %c0_i32 = arith.constant 0 : i32
    %c0_i32_0 = arith.constant 0 : i32
    %c0_i32_1 = arith.constant 0 : i32
    %c0_i32_2 = arith.constant 0 : i32
    return %arg0, %c0_i32, %c0_i32_0, %c0_i32_1 : i32, i32, i32, i32
  }
}

</mosaic_0001>

<bundles_post_ra>
// kernel: tpu_custom_call.1
= control target key start
LH: loop header
LB: loop body
LE: loop exit
PB: predicated region body
PF: predicated region fallthrough
CT: control target
= control target key end

     0   :  { %s2141_s12 = smov 0   ;;  %s3944_s0 = inlined_call_operand.vmem [shape: f32[2,18,18,4], index: 0, kind: input, shape index: {}]   ;;  %s3945_s1 = inlined_call_operand.vmem [shape: f32[36,8], index: 1, kind: input, shape index: {}]   ;;  %s3946_s2 = inlined_call_operand.vmem [shape: f32[1,8], index: 2, kind: input, shape index: {}]   ;;  %s3947_s3 = inlined_call_operand.vmem [shape: f32[2,16,16,8], index: 3, kind: output, shape index: {}]  }
   0x1 LB: > { %s1918_s13 = sadd.s32 4294967295, %s2111_s12   ;;  %p1922_p0 = scmp.ge.s32.totalorder %s2111_s12, 1  ;;  %s2111_s12 = sphi %s2141_s12, %s13_s12  }
   0x2   : > { %p137_p1 = scmp.lt.s32.totalorder %s2111_s12, 3 }
   0x4   : > { %p138_p2 = pnand %p1922_p0, %p137_p1 }
   0x6   : > { %141 = sbr.rel (%p138_p2) target bundleno = 844 (0x34c), region = 32 }
   0xb   : > { %p161_p3 = scmp.lt.s32.totalorder %s1918_s13, 1  ;;  %vm273_vm0 = vcmask 1046528   ;;  %s2113_s18 = smov 4   ;;  %vm450_vm1 = vcmask 1045504   ;;  %vm1602_vm2 = vcmask 1043456   ;;  %vm1229_vm3 = vcmask 31744  }
   0xc   : > { %s2114_s19 = smov 8   ;;  %s2115_s20 = smov 12   ;;  %vm1262_vm4 = vcmask 64512   ;;  %vm1295_vm5 = vcmask 97280   ;;  %vm1328_vm6 = vcmask 130048   ;;  %vm1361_vm7 = vcmask 162816  }
   0xd   : > { %s4269_s13 = smov (!%p161_p3, %s1918_s13), 1  ;;  %s2116_s21 = smov 16   ;;  %vm1394_vm8 = vcmask 195584   ;;  %vm1427_vm9 = vcmask 228352   ;;  %vm1460_vm10 = vcmask 261120   ;;  %vm1505_vm11 = vcmask 293888  }
   0xe   : > { %s2068_s14 = smul.u32 432, %s4269_s13  ;;  %s2117_s22 = smov 20  }
   0xf   : > { %s2118_s23 = smov 24   ;;  %s2119_s28 = smov 28  }
  0x10   : > { %s2155_s17 = scalar_lea.vmem %s3944_s0, %s2068_s14  ;;  %s2120_s8 = smov 32  }
  0x11   : > { %v2158_v0 = vld [vmem:[%s2155_s17 + $0x18] sm:$0xff]  ;;  %v2161_v1 = vld [vmem:[%s2155_s17 + $0x20] sm:$0xff]  ;;  %v2169_v5 = vld [vmem:[%s2155_s17 + $0x8] sm:$0xff]  ;;  %s1962_s9 = sshll.u32 %s4269_s13, 8 }
  0x12   : > { %v2164_v2 = vld [vmem:[%s2155_s17] sm:$0xff]  ;;  %v279_v3 = vrot.slane %v2158_v0, 1  ;;  %v280_v4 = vrot.slane %v2161_v1, 1  ;;  %v2173_v7 = vld [vmem:[%s2155_s17 + $0x28] sm:$0x3]  ;;  %v275_v8 = vrot.slane %v2169_v5, 1  ;;  %s3781_s16 = scalar_lea.vmem %s3947_s3, %s1962_s9 }
  0x13   : > { %v274_v6 = vrot.slane %v2164_v2, 1  ;;  %v282_v9 = vrot.slane %v2173_v7, 1  ;;  %v2178_v10 = vld [vmem:[%s2155_s17 + $0x10] sm:$0x3]  ;;  %v2181_v11 = vld [vmem:[%s2155_s17 + $0x38] sm:$0xff]  ;;  %v2211_v24 = vld [vmem:[%s2155_s17 + $0x48] sm:$0xff] }
  0x14   : > { %v2184_v12 = vsel %vm273_vm0, %v279_v3, %v280_v4  ;;  %v277_v13 = vrot.slane %v2178_v10, 1  ;;  %v2188_v14 = vld [vmem:[%s2155_s17 + $0x40] sm:$0x3]  ;;  %v2191_v15 = vld [vmem:[%s2155_s17 + $0x30] sm:$0xff]  ;;  %v285_v18 = vrot.slane %v2181_v11, 1  ;;  %v289_v29 = vrot.slane %v2211_v24, 1 }
  0x15   : > { %358 = vrot.lane.b32.xlu1 %v2184_v12, %s2113_s18  ;;  %v276_v16 = vsel %vm273_vm0, %v274_v6, %v275_v8  ;;  %v2198_v17 = vsel %vm273_vm0, %v280_v4, %v282_v9  ;;  %v287_v19 = vrot.slane %v2188_v14, 1  ;;  %v284_v21 = vrot.slane %v2191_v15, 1  ;;  %v2205_v22 = vld [vmem:[%s2155_s17 + $0x50] sm:$0xff]  ;;  %v2208_v23 = vld [vmem:[%s2155_s17 + $0x58] sm:$0x3]  ;;  %v2226_v30 = vld [vmem:[%s2155_s17 + $0x68] sm:$0xff] }
  0x16   : > { %354 = vrot.lane.b32.xlu0 %v276_v16, %s2113_s18  ;;  %v278_v20 = vsel %vm273_vm0, %v275_v8, %v277_v13  ;;  %v290_v26 = vrot.slane %v2205_v22, 1  ;;  %v292_v27 = vrot.slane %v2208_v23, 1  ;;  %v2229_v31 = vld [vmem:[%s2155_s17 + $0x70] sm:$0x3]  ;;  %v2232_v32 = vld [vmem:[%s2155_s17 + $0x60] sm:$0xff]  ;;  %v295_v34 = vrot.slane %v2226_v30, 1 }
  0x17   : > { %v2217_v25 = vsel %vm273_vm0, %v285_v18, %v287_v19  ;;  %v2222_v28 = vsel %vm273_vm0, %v284_v21, %v285_v18  ;;  %v297_v35 = vrot.slane %v2229_v31, 1  ;;  %v294_v37 = vrot.slane %v2232_v32, 1  ;;  %v2248_v38 = vld [vmem:[%s2155_s17 + $0x80] sm:$0xff]  ;;  %v2251_v39 = vld [vmem:[%s2155_s17 + $0x88] sm:$0x3]  ;;  %v2254_v40 = vld [vmem:[%s2155_s17 + $0x78] sm:$0xff] }
  0x18   : > { %v2239_v33 = vsel %vm273_vm0, %v290_v26, %v292_v27  ;;  %v2244_v36 = vsel %vm273_vm0, %v289_v29, %v290_v26  ;;  %v300_v42 = vrot.slane %v2248_v38, 1  ;;  %v302_v43 = vrot.slane %v2251_v39, 1  ;;  %v2270_v46 = vld [vmem:[%s2155_s17 + $0x98] sm:$0xff]  ;;  %v2273_v47 = vld [vmem:[%s2155_s17 + $0xa0] sm:$0x3]  ;;  %v2276_v48 = vld [vmem:[%s2155_s17 + $0x90] sm:$0xff] }
  0x19   : > { %360 = vrot.lane.b32.xlu1 %v2198_v17, %s2113_s18  ;;  %4060 = vst [vmem:[#allocation2_spill] sm:$0xff] %v2244_v36  ;;  %v2261_v41 = vsel %vm273_vm0, %v295_v34, %v297_v35  ;;  %v2266_v44 = vsel %vm273_vm0, %v294_v37, %v295_v34  ;;  %v299_v45 = vrot.slane %v2254_v40, 1  ;;  %v305_v50 = vrot.slane %v2270_v46, 1  ;;  %v2292_v54 = vld [vmem:[%s2155_s17 + $0xb0] sm:$0xff]  ;;  %v2295_v55 = vld [vmem:[%s2155_s17 + $0xb8] sm:$0x3] }
  0x1a   : > { %356 = vrot.lane.b32.xlu0 %v278_v20, %s2113_s18  ;;  %4061 = vst [vmem:[#allocation3_spill] sm:$0xff] %v2261_v41  ;;  %4062 = vst [vmem:[#allocation4_spill] sm:$0xff] %v2266_v44  ;;  %v2283_v49 = vsel %vm273_vm0, %v300_v42, %v302_v43  ;;  %v307_v51 = vrot.slane %v2273_v47, 1  ;;  %v304_v53 = vrot.slane %v2276_v48, 1  ;;  %v2298_v56 = vld [vmem:[%s2155_s17 + $0xa8] sm:$0xff]  ;;  %v310_v58 = vrot.slane %v2292_v54, 1 }
  0x1b   : > { %4063 = vst [vmem:[#allocation5_spill] sm:$0xff] %v2283_v49  ;;  %v2288_v52 = vsel %vm273_vm0, %v299_v45, %v300_v42  ;;  %v312_v59 = vrot.slane %v2295_v55, 1  ;;  %v309_v61 = vrot.slane %v2298_v56, 1  ;;  %v2314_v62 = vld [vmem:[%s2155_s17 + $0xc8] sm:$0xff]  ;;  %v2317_v63 = vld [vmem:[%s2155_s17 + $0xd0] sm:$0x3] }
  0x1c   : > { %4064 = vst [vmem:[#allocation6_spill] sm:$0xff] %v2288_v52  ;;  %v2305_v57 = vsel %vm273_vm0, %v305_v50, %v307_v51  ;;  %v2310_v60 = vsel %vm273_vm0, %v304_v53, %v305_v50  ;;  %v2320_v3 = vld [vmem:[%s2155_s17 + $0xc0] sm:$0xff]  ;;  %v315_v6 = vrot.slane %v2314_v62, 1  ;;  %v317_v8 = vrot.slane %v2317_v63, 1  ;;  %v2339_v18 = vld [vmem:[%s2155_s17 + $0xe8] sm:$0x3] }
  0x1d   : > { %364 = vrot.lane.b32.xlu1 %v2217_v25, %s2113_s18  ;;  %4065 = vst [vmem:[#allocation7_spill] sm:$0xff] %v2305_v57  ;;  %4066 = vst [vmem:[#allocation8_spill] sm:$0xff] %v2310_v60  ;;  %v2327_v4 = vsel %vm273_vm0, %v310_v58, %v312_v59  ;;  %v2332_v9 = vsel %vm273_vm0, %v309_v61, %v310_v58  ;;  %v314_v13 = vrot.slane %v2320_v3, 1  ;;  %v2336_v16 = vld [vmem:[%s2155_s17 + $0xe0] sm:$0xff]  ;;  %v2342_v19 = vld [vmem:[%s2155_s17 + $0xd8] sm:$0xff]  ;;  %v322_v26 = vrot.slane %v2339_v18, 1 }
  0x1e   : > { %362 = vrot.lane.b32.xlu0 %v2222_v28, %s2113_s18  ;;  %4067 = vst [vmem:[#allocation9_spill] sm:$0xff] %v2327_v4  ;;  %4068 = vst [vmem:[#allocation10_spill] sm:$0xff] %v2332_v9  ;;  %v2349_v20 = vsel %vm273_vm0, %v315_v6, %v317_v8  ;;  %v320_v21 = vrot.slane %v2336_v16, 1  ;;  %v319_v29 = vrot.slane %v2342_v19, 1  ;;  %v2358_v34 = vld [vmem:[%s2155_s17 + $0xf8] sm:$0xff]  ;;  %v2364_v37 = vld [vmem:[%s2155_s17 + $0xf0] sm:$0xff] }
  0x1f   : > { %4069 = vst [vmem:[#allocation11_spill] sm:$0xff] %v2349_v20  ;;  %v2354_v27 = vsel %vm273_vm0, %v314_v13, %v315_v6  ;;  %v2361_v35 = vld [vmem:[%s2155_s17 + $0x100] sm:$0x3]  ;;  %v325_v43 = vrot.slane %v2358_v34, 1  ;;  %v324_v51 = vrot.slane %v2364_v37, 1  ;;  %v2380_v53 = vld [vmem:[%s2155_s17 + $0x110] sm:$0xff] }
  0x20   : > { %4070 = vst [vmem:[#allocation12_spill] sm:$0xff] %v2354_v27  ;;  %v2371_v42 = vsel %vm273_vm0, %v320_v21, %v322_v26  ;;  %v327_v45 = vrot.slane %v2361_v35, 1  ;;  %v2376_v50 = vsel %vm273_vm0, %v319_v29, %v320_v21  ;;  %v2383_v58 = vld [vmem:[%s2155_s17 + $0x118] sm:$0x3]  ;;  %v2386_v59 = vld [vmem:[%s2155_s17 + $0x108] sm:$0xff]  ;;  %v330_v6 = vrot.slane %v2380_v53, 1 }
  0x21   : > { %368 = vrot.lane.b32.xlu1 %v2239_v33, %s2113_s18  ;;  %4071 = vst [vmem:[#allocation13_spill] sm:$0xff] %v2371_v42  ;;  %4072 = vst [vmem:[#allocation14_spill] sm:$0xff] %v2376_v50  ;;  %v332_v8 = vrot.slane %v2383_v58, 1  ;;  %v2398_v13 = vsel %vm273_vm0, %v324_v51, %v325_v43  ;;  %v329_v21 = vrot.slane %v2386_v59, 1  ;;  %v2402_v26 = vld [vmem:[%s2155_s17 + $0x128] sm:$0xff] }
  0x22   : > { %366 = vrot.lane.b32.xlu0 %v2244_v36, %s2113_s18  ;;  %v2393_v61 = vsel %vm273_vm0, %v325_v43, %v327_v45  ;;  %4074 = vst [vmem:[#allocation16_spill] sm:$0xff] %v2398_v13  ;;  %4075 = vst [vmem:[#allocation17_spill] sm:$0xff] %v2402_v26  ;;  %v2405_v29 = vld [vmem:[%s2155_s17 + $0x130] sm:$0x3]  ;;  %v335_v43 = vrot.slane %v2402_v26, 1 }
  0x23   : > { %4073 = vst [vmem:[#allocation15_spill] sm:$0xff] %v2393_v61  ;;  %v2415_v45 = vsel %vm273_vm0, %v330_v6, %v332_v8  ;;  %v337_v51 = vrot.slane %v2405_v29, 1 }
  0x24   : > { %4077 = vst [vmem:[#allocation19_spill] sm:$0xff] %v2415_v45 }
  0x25   : > { %372 = vrot.lane.b32.xlu1 %v2261_v41, %s2113_s18  ;;  %v2437_v8 = vsel %vm273_vm0, %v335_v43, %v337_v51 }
  0x26   : > { %370 = vrot.lane.b32.xlu0 %v2266_v44, %s2113_s18  ;;  %4081 = vst [vmem:[#allocation23_spill] sm:$0xff] %v2437_v8  ;;  %v2471_v44 = vld [vmem:[%s2155_s17 + $0x178] sm:$0x3] }
  0x29   : > { %376 = vrot.lane.b32.xlu1 %v2283_v49, %s2113_s18  ;;  %v2468_v49 = vld [vmem:[%s2155_s17 + $0x170] sm:$0xff] }
  0x2a   : > { %374 = vrot.lane.b32.xlu0 %v2288_v52, %s2113_s18  ;;  %4087 = vst [vmem:[#allocation29_spill] sm:$0xff] %v2468_v49 }
  0x2d   : > { %380 = vrot.lane.b32.xlu1 %v2305_v57, %s2113_s18 }
  0x2e   : > { %378 = vrot.lane.b32.xlu0 %v2310_v60, %s2113_s18  ;;  %v2446_v60 = vld [vmem:[%s2155_s17 + $0x158] sm:$0xff] }
  0x2f   : > { %4083 = vst [vmem:[#allocation25_spill] sm:$0xff] %v2446_v60 }
  0x31   : > { %384 = vrot.lane.b32.xlu1 %v2327_v4, %s2113_s18 }
  0x32   : > { %382 = vrot.lane.b32.xlu0 %v2332_v9, %s2113_s18 }
  0x35   : > { %388 = vrot.lane.b32.xlu1 %v2349_v20, %s2113_s18  ;;  %v2424_v20 = vld [vmem:[%s2155_s17 + $0x140] sm:$0xff] }
  0x36   : > { %386 = vrot.lane.b32.xlu0 %v2354_v27, %s2113_s18  ;;  %4079 = vst [vmem:[#allocation21_spill] sm:$0xff] %v2424_v20 }
  0x39   : > { %392 = vrot.lane.b32.xlu1 %v2371_v42, %s2113_s18  ;;  %v2420_v42 = vsel %vm273_vm0, %v329_v21, %v330_v6  ;;  %v340_v6 = vrot.slane %v2424_v20, 1 }
  0x3a   : > { %390 = vrot.lane.b32.xlu0 %v2376_v50, %s2113_s18  ;;  %v2408_v50 = vld [vmem:[%s2155_s17 + $0x120] sm:$0xff]  ;;  %4078 = vst [vmem:[#allocation20_spill] sm:$0xff] %v2420_v42 }
  0x3b   : > { %4076 = vst [vmem:[#allocation18_spill] sm:$0xff] %v2408_v50  ;;  %v334_v27 = vrot.slane %v2408_v50, 1 }
  0x3d   : > { %396 = vrot.lane.b32.xlu1 %v2393_v61, %s2113_s18  ;;  %v2427_v61 = vld [vmem:[%s2155_s17 + $0x148] sm:$0x3]  ;;  %v2442_v9 = vsel %vm273_vm0, %v334_v27, %v335_v43  ;;  %v345_v27 = vrot.slane %v2446_v60, 1 }
  0x3e   : > { %394 = vrot.lane.b32.xlu0 %v2398_v13, %s2113_s18  ;;  %v2430_v13 = vld [vmem:[%s2155_s17 + $0x138] sm:$0xff]  ;;  %v342_v21 = vrot.slane %v2427_v61, 1  ;;  %4082 = vst [vmem:[#allocation24_spill] sm:$0xff] %v2442_v9 }
  0x3f   : > { %4080 = vst [vmem:[#allocation22_spill] sm:$0xff] %v2430_v13  ;;  %v339_v4 = vrot.slane %v2430_v13, 1 }
  0x40   : > { %v2459_v51 = vsel %vm273_vm0, %v340_v6, %v342_v21 }
  0x41   : > { %400 = vrot.lane.b32.xlu1 %v2415_v45, %s2113_s18  ;;  %v2449_v45 = vld [vmem:[%s2155_s17 + $0x160] sm:$0x3]  ;;  %4085 = vst [vmem:[#allocation27_spill] sm:$0xff] %v2459_v51  ;;  %v2464_v57 = vsel %vm273_vm0, %v339_v4, %v340_v6  ;;  %v350_v4 = vrot.slane %v2468_v49, 1  ;;  %v352_v6 = vrot.slane %v2471_v44, 1 }
  0x42   : > { %398 = vrot.lane.b32.xlu0 %v2420_v42, %s2113_s18  ;;  %v2452_v42 = vld [vmem:[%s2155_s17 + $0x150] sm:$0xff]  ;;  %v347_v43 = vrot.slane %v2449_v45, 1  ;;  %4086 = vst [vmem:[#allocation28_spill] sm:$0xff] %v2464_v57 }
  0x43   : > { %4084 = vst [vmem:[#allocation26_spill] sm:$0xff] %v2452_v42  ;;  %v344_v52 = vrot.slane %v2452_v42, 1 }
  0x44   : > { %v2481_v21 = vsel %vm273_vm0, %v345_v27, %v347_v43  ;;  %v452_v43 = vrot.slane %v2169_v5, 2  ;;  %v459_v5 = vrot.slane %v2173_v7, 2  ;;  %v461_v7 = vrot.slane %v2191_v15, 2 }
  0x45   : > { %404 = vrot.lane.b32.xlu1 %v2437_v8, %s2113_s18  ;;  %v2474_v8 = vld [vmem:[%s2155_s17 + $0x168] sm:$0xff]  ;;  %4089 = vst [vmem:[#allocation31_spill] sm:$0xff] %v2481_v21 }
  0x46   : > { %402 = vrot.lane.b32.xlu0 %v2442_v9, %s2113_s18  ;;  %4088 = vst [vmem:[#allocation30_spill] sm:$0xff] %v2474_v8  ;;  %v2486_v9 = vsel %vm273_vm0, %v344_v52, %v345_v27  ;;  %v349_v41 = vrot.slane %v2474_v8, 1  ;;  %v451_v52 = vrot.slane %v2164_v2, 2 }
  0x47   : > { %4090 = vst [vmem:[#allocation32_spill] sm:$0xff] %v2486_v9 }
  0x48   : > { %v2499_v36 = vsel %vm273_vm0, %v349_v41, %v350_v4  ;;  %v456_v41 = vrot.slane %v2158_v0, 2 }
  0x49   : > { %408 = vrot.lane.b32.xlu1 %v2459_v51, %s2113_s18  ;;  %v2494_v51 = vsel %vm273_vm0, %v350_v4, %v352_v6  ;;  %4092 = vst [vmem:[#allocation34_spill] sm:$0xff] %v2499_v36  ;;  %v457_v6 = vrot.slane %v2161_v1, 2  ;;  %v462_v4 = vrot.slane %v2181_v11, 2 }
  0x4a   : > { %406 = vrot.lane.b32.xlu0 %v2464_v57, %s2113_s18  ;;  %4091 = vst [vmem:[#allocation33_spill] sm:$0xff] %v2494_v51  ;;  %v454_v57 = vrot.slane %v2178_v10, 2  ;;  %v453_v10 = vsel %vm450_vm1, %v451_v52, %v452_v43  ;;  %v467_v52 = vrot.slane %v2205_v22, 2 }
  0x4b   : > { %v2514_v2 = vsel %vm450_vm1, %v457_v6, %v459_v5 }
  0x4c   : > { %v455_v27 = vsel %vm450_vm1, %v452_v43, %v454_v57  ;;  %v464_v57 = vrot.slane %v2188_v14, 2  ;;  %v2532_v14 = vsel %vm450_vm1, %v461_v7, %v462_v4  ;;  %v477_v7 = vrot.slane %v2248_v38, 2 }
  0x4d   : > { %412 = vrot.lane.b32.xlu1 %v2481_v21, %s2113_s18  ;;  %v489_v21 = vrot.slane %v2295_v55, 2 }
  0x4e   : > { %410 = vrot.lane.b32.xlu0 %v2486_v9, %s2113_s18  ;;  %v2527_v43 = vsel %vm450_vm1, %v462_v4, %v464_v57  ;;  %v471_v4 = vrot.slane %v2232_v32, 2  ;;  %v494_v9 = vrot.slane %v2317_v63, 2 }
  0x51   : > { %416 = vrot.lane.b32.xlu1 %v2494_v51, %s2113_s18  ;;  %v2519_v51 = vsel %vm450_vm1, %v456_v41, %v457_v6  ;;  %v466_v6 = vrot.slane %v2211_v24, 2  ;;  %v474_v41 = vrot.slane %v2229_v31, 2 }
  0x52   : > { %414 = vrot.lane.b32.xlu0 %v2499_v36, %s2113_s18  ;;  %v484_v36 = vrot.slane %v2273_v47, 2 }
  0x55   : > { %533 = vrot.lane.b32.xlu1 %v455_v27, %s2114_s19  ;;  %v469_v27 = vrot.slane %v2208_v23, 2  ;;  %v2545_v23 = vsel %vm450_vm1, %v466_v6, %v467_v52 }
  0x56   : > { %531 = vrot.lane.b32.xlu0 %v453_v10, %s2114_s19  ;;  %v472_v10 = vrot.slane %v2226_v30, 2  ;;  %4094 = vst [vmem:[#allocation36_spill] sm:$0xff] %v2545_v23 }
  0x57   : > { %v2540_v5 = vsel %vm450_vm1, %v467_v52, %v469_v27  ;;  %v479_v27 = vrot.slane %v2251_v39, 2  ;;  %v476_v52 = vrot.slane %v2254_v40, 2 }
  0x58   : > { %4093 = vst [vmem:[#allocation35_spill] sm:$0xff] %v2540_v5  ;;  %v2553_v57 = vsel %vm450_vm1, %v472_v10, %v474_v41  ;;  %v2558_v31 = vsel %vm450_vm1, %v471_v4, %v472_v10  ;;  %v482_v41 = vrot.slane %v2270_v46, 2  ;;  %v481_v10 = vrot.slane %v2276_v48, 2 }
  0x59   : > { %537 = vrot.lane.b32.xlu1 %v2514_v2, %s2114_s19  ;;  %4095 = vst [vmem:[#allocation37_spill] sm:$0xff] %v2553_v57  ;;  %4096 = vst [vmem:[#allocation38_spill] sm:$0xff] %v2558_v31  ;;  %v2566_v6 = vsel %vm450_vm1, %v477_v7, %v479_v27  ;;  %v2571_v39 = vsel %vm450_vm1, %v476_v52, %v477_v7  ;;  %v487_v27 = vrot.slane %v2292_v54, 2  ;;  %v486_v7 = vrot.slane %v2298_v56, 2 }
  0x5a   : > { %535 = vrot.lane.b32.xlu0 %v2519_v51, %s2114_s19  ;;  %4097 = vst [vmem:[#allocation39_spill] sm:$0xff] %v2566_v6  ;;  %4098 = vst [vmem:[#allocation40_spill] sm:$0xff] %v2571_v39  ;;  %v2579_v4 = vsel %vm450_vm1, %v482_v41, %v484_v36  ;;  %v2584_v47 = vsel %vm450_vm1, %v481_v10, %v482_v41  ;;  %v492_v36 = vrot.slane %v2314_v62, 2  ;;  %v491_v41 = vrot.slane %v2320_v3, 2 }
  0x5b   : > { %4099 = vst [vmem:[#allocation41_spill] sm:$0xff] %v2579_v4  ;;  %4100 = vst [vmem:[#allocation42_spill] sm:$0xff] %v2584_v47  ;;  %v2592_v52 = vsel %vm450_vm1, %v487_v27, %v489_v21  ;;  %v2597_v55 = vsel %vm450_vm1, %v486_v7, %v487_v27  ;;  %v497_v21 = vrot.slane %v2336_v16, 2  ;;  %v496_v27 = vrot.slane %v2342_v19, 2 }
  0x5c   : > { %4101 = vst [vmem:[#allocation43_spill] sm:$0xff] %v2592_v52  ;;  %4102 = vst [vmem:[#allocation44_spill] sm:$0xff] %v2597_v55  ;;  %v2605_v10 = vsel %vm450_vm1, %v492_v36, %v494_v9  ;;  %v2610_v63 = vsel %vm450_vm1, %v491_v41, %v492_v36  ;;  %v502_v9 = vrot.slane %v2358_v34, 2  ;;  %v501_v36 = vrot.slane %v2364_v37, 2 }
  0x5d   : > { %541 = vrot.lane.b32.xlu1 %v2527_v43, %s2114_s19  ;;  %4103 = vst [vmem:[#allocation45_spill] sm:$0xff] %v2605_v10  ;;  %4104 = vst [vmem:[#allocation46_spill] sm:$0xff] %v2610_v63 }
  0x5e   : > { %539 = vrot.lane.b32.xlu0 %v2532_v14, %s2114_s19 }
  0x61   : > { %545 = vrot.lane.b32.xlu1 %v2540_v5, %s2114_s19 }
  0x62   : > { %543 = vrot.lane.b32.xlu0 %v2545_v23, %s2114_s19 }
  0x65   : > { %549 = vrot.lane.b32.xlu1 %v2553_v57, %s2114_s19 }
  0x66   : > { %547 = vrot.lane.b32.xlu0 %v2558_v31, %s2114_s19 }
  0x69   : > { %553 = vrot.lane.b32.xlu1 %v2566_v6, %s2114_s19 }
  0x6a   : > { %551 = vrot.lane.b32.xlu0 %v2571_v39, %s2114_s19 }
  0x6d   : > { %557 = vrot.lane.b32.xlu1 %v2579_v4, %s2114_s19  ;;  %v499_v4 = vrot.slane %v2339_v18, 2  ;;  %v2623_v18 = vsel %vm450_vm1, %v496_v27, %v497_v21 }
  0x6e   : > { %555 = vrot.lane.b32.xlu0 %v2584_v47, %s2114_s19  ;;  %4106 = vst [vmem:[#allocation48_spill] sm:$0xff] %v2623_v18  ;;  %v524_v47 = vrot.slane %v2449_v45, 2  ;;  %v527_v45 = vrot.slane %v2468_v49, 2 }
  0x6f   : > { %v2618_v7 = vsel %vm450_vm1, %v497_v21, %v499_v4  ;;  %v507_v4 = vrot.slane %v2380_v53, 2  ;;  %v506_v21 = vrot.slane %v2386_v59, 2 }
  0x70   : > { %4105 = vst [vmem:[#allocation47_spill] sm:$0xff] %v2618_v7 }
  0x71   : > { %561 = vrot.lane.b32.xlu1 %v2592_v52, %s2114_s19  ;;  %v504_v52 = vrot.slane %v2361_v35, 2  ;;  %v2636_v35 = vsel %vm450_vm1, %v501_v36, %v502_v9 }
  0x72   : > { %559 = vrot.lane.b32.xlu0 %v2597_v55, %s2114_s19  ;;  %v519_v55 = vrot.slane %v2427_v61, 2 }
  0x73   : > { %v2631_v41 = vsel %vm450_vm1, %v502_v9, %v504_v52  ;;  %v512_v52 = vrot.slane %v2402_v26, 2  ;;  %v511_v9 = vrot.slane %v2408_v50, 2 }
  0x75   : > { %565 = vrot.lane.b32.xlu1 %v2605_v10, %s2114_s19  ;;  %v509_v10 = vrot.slane %v2383_v58, 2  ;;  %v2649_v58 = vsel %vm450_vm1, %v506_v21, %v507_v4 }
  0x76   : > { %563 = vrot.lane.b32.xlu0 %v2610_v63, %s2114_s19  ;;  %v514_v63 = vrot.slane %v2405_v29, 2  ;;  %4108 = vst [vmem:[#allocation50_spill] sm:$0xff] %v2649_v58  ;;  %v2662_v29 = vsel %vm450_vm1, %v511_v9, %v512_v52 }
  0x77   : > { %v2644_v27 = vsel %vm450_vm1, %v507_v4, %v509_v10  ;;  %v517_v10 = vrot.slane %v2424_v20, 2  ;;  %4110 = vst [vmem:[#allocation52_spill] sm:$0xff] %v2662_v29  ;;  %v516_v4 = vrot.slane %v2430_v13, 2 }
  0x78   : > { %4107 = vst [vmem:[#allocation49_spill] sm:$0xff] %v2644_v27  ;;  %v2657_v36 = vsel %vm450_vm1, %v512_v52, %v514_v63  ;;  %v522_v63 = vrot.slane %v2446_v60, 2  ;;  %v521_v52 = vrot.slane %v2452_v42, 2 }
  0x79   : > { %569 = vrot.lane.b32.xlu1 %v2618_v7, %s2114_s19  ;;  %4109 = vst [vmem:[#allocation51_spill] sm:$0xff] %v2657_v36  ;;  %v2670_v21 = vsel %vm450_vm1, %v517_v10, %v519_v55  ;;  %v2677_v61 = vsel %vm450_vm1, %v516_v4, %v517_v10  ;;  %v526_v4 = vrot.slane %v2474_v8, 2 }
  0x7a   : > { %567 = vrot.lane.b32.xlu0 %v2623_v18, %s2114_s19  ;;  %4111 = vst [vmem:[#allocation53_spill] sm:$0xff] %v2670_v21  ;;  %4113 = vst [vmem:[#allocation55_spill] sm:$0xff] %v2677_v61  ;;  %v2687_v55 = vsel %vm450_vm1, %v522_v63, %v524_v47  ;;  %v2694_v10 = vsel %vm450_vm1, %v521_v52, %v522_v63 }
  0x7b   : > { %4115 = vst [vmem:[#allocation57_spill] sm:$0xff] %v2687_v55  ;;  %4117 = vst [vmem:[#allocation59_spill] sm:$0xff] %v2694_v10 }
  0x7d   : > { %573 = vrot.lane.b32.xlu1 %v2631_v41, %s2114_s19 }
  0x7e   : > { %571 = vrot.lane.b32.xlu0 %v2636_v35, %s2114_s19 }
  0x81   : > { %577 = vrot.lane.b32.xlu1 %v2644_v27, %s2114_s19 }
  0x82   : > { %575 = vrot.lane.b32.xlu0 %v2649_v58, %s2114_s19 }
  0x85   : > { %581 = vrot.lane.b32.xlu1 %v2657_v36, %s2114_s19 }
  0x86   : > { %579 = vrot.lane.b32.xlu0 %v2662_v29, %s2114_s19 }
  0x87   : > { %v2674_v6 = vpop.permute.xlu1 %358 }
  0x88   : > { %4112 = vst [vmem:[#allocation54_spill] sm:$0xff] %v2674_v6  ;;  %v2680_v9 = vpop.permute.xlu0 %354  ;;  %v529_v6 = vrot.slane %v2471_v44, 2  ;;  %v2709_v44 = vsel %vm450_vm1, %v526_v4, %v527_v45 }
  0x89   : > { %4114 = vst [vmem:[#allocation56_spill] sm:$0xff] %v2680_v9  ;;  %585 = vrot.lane.b32.xlu1 %v2670_v21, %s2114_s19  ;;  %4120 = vst [vmem:[#allocation62_spill] sm:$0xff] %v2709_v44 }
  0x8a   : > { %583 = vrot.lane.b32.xlu0 %v2677_v61, %s2114_s19  ;;  %v2704_v47 = vsel %vm450_vm1, %v527_v45, %v529_v6 }
  0x8b   : > { %v2691_v39 = vpop.permute.xlu1 %360  ;;  %4119 = vst [vmem:[#allocation61_spill] sm:$0xff] %v2704_v47 }
  0x8c   : > { %4116 = vst [vmem:[#allocation58_spill] sm:$0xff] %v2691_v39  ;;  %v2697_v9 = vpop.permute.xlu0 %356 }
  0x8d   : > { %4118 = vst [vmem:[#allocation60_spill] sm:$0xff] %v2697_v9  ;;  %589 = vrot.lane.b32.xlu1 %v2687_v55, %s2114_s19 }
  0x8e   : > { %587 = vrot.lane.b32.xlu0 %v2694_v10, %s2114_s19 }
  0x8f   : > { %v2706_v21 = vpop.permute.xlu1 %364 }
  0x90   : > { %v2711_v63 = vpop.permute.xlu0 %362 }
  0x91   : > { %593 = vrot.lane.b32.xlu1 %v2704_v47, %s2114_s19 }
  0x92   : > { %591 = vrot.lane.b32.xlu0 %v2709_v44, %s2114_s19 }
  0x93   : > { %v2717_v52 = vpop.permute.xlu1 %368 }
  0x94   : > { %v2719_v39 = vpop.permute.xlu0 %366 }
  0x95   : > { %631 = vrot.lane.b32.xlu1 %v2161_v1, %s2115_s20 }
  0x96   : > { %629 = vrot.lane.b32.xlu0 %v2158_v0, %s2115_s20 }
  0x97   : > { %v2725_v6 = vpop.permute.xlu1 %372 }
  0x98   : > { %v2727_v45 = vpop.permute.xlu0 %370 }
  0x99   : > { %635 = vrot.lane.b32.xlu1 %v2181_v11, %s2115_s20 }
  0x9a   : > { %633 = vrot.lane.b32.xlu0 %v2191_v15, %s2115_s20 }
  0x9b   : > { %v2733_v4 = vpop.permute.xlu1 %376 }
  0x9c   : > { %v2735_v47 = vpop.permute.xlu0 %374 }
  0x9d   : > { %639 = vrot.lane.b32.xlu1 %v2205_v22, %s2115_s20 }
  0x9e   : > { %637 = vrot.lane.b32.xlu0 %v2211_v24, %s2115_s20 }
  0x9f   : > { %v2741_v0 = vpop.permute.xlu1 %380 }
  0xa0   : > { %v2743_v1 = vpop.permute.xlu0 %378 }
  0xa1   : > { %643 = vrot.lane.b32.xlu1 %v2226_v30, %s2115_s20 }
  0xa2   : > { %641 = vrot.lane.b32.xlu0 %v2232_v32, %s2115_s20 }
  0xa3   : > { %v2749_v44 = vpop.permute.xlu1 %384 }
  0xa4   : > { %v2751_v55 = vpop.permute.xlu0 %382 }
  0xa5   : > { %647 = vrot.lane.b32.xlu1 %v2248_v38, %s2115_s20 }
  0xa6   : > { %645 = vrot.lane.b32.xlu0 %v2254_v40, %s2115_s20 }
  0xa7   : > { %v2757_v10 = vpop.permute.xlu1 %388 }
  0xa8   : > { %4121 = vst [vmem:[#allocation63_spill] sm:$0xff] %v2757_v10  ;;  %v2759_v9 = vpop.permute.xlu0 %386 }
  0xa9   : > { %4122 = vst [vmem:[#allocation64_spill] sm:$0xff] %v2759_v9  ;;  %651 = vrot.lane.b32.xlu1 %v2270_v46, %s2115_s20 }
  0xaa   : > { %649 = vrot.lane.b32.xlu0 %v2276_v48, %s2115_s20 }
  0xab   : > { %v2765_v61 = vpop.permute.xlu1 %392 }
  0xac   : > { %4123 = vst [vmem:[#allocation65_spill] sm:$0xff] %v2765_v61  ;;  %v2767_v57 = vpop.permute.xlu0 %390 }
  0xad   : > { %4124 = vst [vmem:[#allocation66_spill] sm:$0xff] %v2767_v57  ;;  %655 = vrot.lane.b32.xlu1 %v2292_v54, %s2115_s20 }
  0xae   : > { %653 = vrot.lane.b32.xlu0 %v2298_v56, %s2115_s20 }
  0xaf   : > { %v2773_v36 = vpop.permute.xlu1 %396 }
  0xb0   : > { %v2775_v10 = vpop.permute.xlu0 %394 }
  0xb1   : > { %659 = vrot.lane.b32.xlu1 %v2314_v62, %s2115_s20 }
  0xb2   : > { %657 = vrot.lane.b32.xlu0 %v2320_v3, %s2115_s20 }
  0xb3   : > { %v2781_v9 = vpop.permute.xlu1 %400 }
  0xb4   : > { %4125 = vst [vmem:[#allocation67_spill] sm:$0xff] %v2781_v9  ;;  %v2783_v61 = vpop.permute.xlu0 %398 }
  0xb5   : > { %4126 = vst [vmem:[#allocation68_spill] sm:$0xff] %v2783_v61  ;;  %663 = vrot.lane.b32.xlu1 %v2336_v16, %s2115_s20  ;;  %v4152_v61 = vld [vmem:[#allocation9_spill] sm:$0xff] }
  0xb6   : > { %661 = vrot.lane.b32.xlu0 %v2342_v19, %s2115_s20 }
  0xb7   : > { %v2789_v57 = vpop.permute.xlu1 %404 }
  0xb8   : > { %4127 = vst [vmem:[#allocation69_spill] sm:$0xff] %v2789_v57  ;;  %v2791_v29 = vpop.permute.xlu0 %402  ;;  %v4148_v57 = vld [vmem:[#allocation7_spill] sm:$0xff] }
  0xb9   : > { %4128 = vst [vmem:[#allocation70_spill] sm:$0xff] %v2791_v29  ;;  %667 = vrot.lane.b32.xlu1 %v2358_v34, %s2115_s20 }
  0xba   : > { %665 = vrot.lane.b32.xlu0 %v2364_v37, %s2115_s20 }
  0xbb   : > { %v2797_v62 = vpop.permute.xlu1 %408 }
  0xbc   : > { %4129 = vst [vmem:[#allocation71_spill] sm:$0xff] %v2797_v62  ;;  %v2799_v3 = vpop.permute.xlu0 %406  ;;  %v4144_v62 = vld [vmem:[#allocation5_spill] sm:$0xff] }
  0xbd   : > { %4130 = vst [vmem:[#allocation72_spill] sm:$0xff] %v2799_v3  ;;  %671 = vrot.lane.b32.xlu1 %v2380_v53, %s2115_s20  ;;  %v4143_v3 = vld [vmem:[#allocation4_spill] sm:$0xff] }
  0xbe   : > { %669 = vrot.lane.b32.xlu0 %v2386_v59, %s2115_s20 }
  0xbf   : > { %v2805_v16 = vpop.permute.xlu1 %412 }
  0xc0   : > { %4131 = vst [vmem:[#allocation73_spill] sm:$0xff] %v2805_v16  ;;  %v2807_v19 = vpop.permute.xlu0 %410 }
  0xc1   : > { %4132 = vst [vmem:[#allocation74_spill] sm:$0xff] %v2807_v19  ;;  %675 = vrot.lane.b32.xlu1 %v2402_v26, %s2115_s20 }
  0xc2   : > { %673 = vrot.lane.b32.xlu0 %v2408_v50, %s2115_s20  ;;  %v4145_v50 = vld [vmem:[#allocation6_spill] sm:$0xff] }
  0xc3   : > { %v2813_v31 = vpop.permute.xlu1 %416 }
  0xc4   : > { %4133 = vst [vmem:[#allocation75_spill] sm:$0xff] %v2813_v31  ;;  %v2815_v5 = vpop.permute.xlu0 %414 }
  0xc5   : > { %4134 = vst [vmem:[#allocation76_spill] sm:$0xff] %v2815_v5  ;;  %679 = vrot.lane.b32.xlu1 %v2424_v20, %s2115_s20  ;;  %v2838_v5 = vld [vmem:[%s2155_s17 + $0x188] sm:$0xff] }
  0xc6   : > { %677 = vrot.lane.b32.xlu0 %v2430_v13, %s2115_s20  ;;  %4139 = vst [vmem:[#allocation81_spill] sm:$0xff] %v2838_v5  ;;  %v4142_v13 = vld [vmem:[#allocation3_spill] sm:$0xff] }
  0xc7   : > { %v2821_v27 = vpop.permute.xlu1 %533 }
  0xc8   : > { %4135 = vst [vmem:[#allocation77_spill] sm:$0xff] %v2821_v27  ;;  %v2823_v19 = vpop.permute.xlu0 %531 }
  0xc9   : > { %4136 = vst [vmem:[#allocation78_spill] sm:$0xff] %v2823_v19  ;;  %683 = vrot.lane.b32.xlu1 %v2446_v60, %s2115_s20  ;;  %v2843_v19 = vld [vmem:[%s2155_s17 + $0x180] sm:$0xff] }
  0xca   : > { %681 = vrot.lane.b32.xlu0 %v2452_v42, %s2115_s20  ;;  %4140 = vst [vmem:[#allocation82_spill] sm:$0xff] %v2843_v19 }
  0xcb   : > { %v2829_v16 = vpop.permute.xlu1 %537 }
  0xcc   : > { %4137 = vst [vmem:[#allocation79_spill] sm:$0xff] %v2829_v16  ;;  %v2831_v31 = vpop.permute.xlu0 %535 }
  0xcd   : > { %4138 = vst [vmem:[#allocation80_spill] sm:$0xff] %v2831_v31  ;;  %687 = vrot.lane.b32.xlu1 %v2468_v49, %s2115_s20 }
  0xce   : > { %685 = vrot.lane.b32.xlu0 %v2474_v8, %s2115_s20 }
  0xcf   : > { %v2840_v27 = vpop.permute.xlu1 %541 }
  0xd0   : > { %v2845_v60 = vpop.permute.xlu0 %539 }
  0xd1   : > { %691 = vrot.lane.b32.xlu1 %v2838_v5, %s2115_s20 }
  0xd2   : > { %689 = vrot.lane.b32.xlu0 %v2843_v19, %s2115_s20 }
  0xd3   : > { %v2851_v16 = vpop.permute.xlu1 %545 }
  0xd4   : > { %v2853_v31 = vpop.permute.xlu0 %543 }
  0xd5   : > { %733 = vrot.lane.b32.xlu1 %v2198_v17, %s2116_s21  ;;  %v4141_v17 = vld [vmem:[#allocation2_spill] sm:$0xff] }
  0xd6   : > { %731 = vrot.lane.b32.xlu0 %v2184_v12, %s2116_s21 }
  0xd7   : > { %v2859_v8 = vpop.permute.xlu1 %549 }
  0xd8   : > { %v2861_v49 = vpop.permute.xlu0 %547 }
  0xd9   : > { %737 = vrot.lane.b32.xlu1 %v2217_v25, %s2116_s21 }
  0xda   : > { %735 = vrot.lane.b32.xlu0 %v2222_v28, %s2116_s21 }
  0xdb   : > { %v2867_v5 = vpop.permute.xlu1 %553 }
  0xdc   : > { %v2869_v19 = vpop.permute.xlu0 %551 }
  0xdd   : > { %741 = vrot.lane.b32.xlu1 %v2239_v33, %s2116_s21 }
  0xde   : > { %739 = vrot.lane.b32.xlu0 %v4141_v17, %s2116_s21 }
  0xdf   : > { %v2875_v12 = vpop.permute.xlu1 %557 }
  0xe0   : > { %v2877_v42 = vpop.permute.xlu0 %555 }
  0xe1   : > { %745 = vrot.lane.b32.xlu1 %v4142_v13, %s2116_s21  ;;  %v4149_v13 = vld [vmem:[#allocation8_spill] sm:$0xff] }
  0xe2   : > { %743 = vrot.lane.b32.xlu0 %v4143_v3, %s2116_s21 }
  0xe3   : > { %v2883_v58 = vpop.permute.xlu1 %561 }
  0xe4   : > { %v2885_v20 = vpop.permute.xlu0 %559 }
  0xe5   : > { %749 = vrot.lane.b32.xlu1 %v4144_v62, %s2116_s21  ;;  %v4153_v62 = vld [vmem:[#allocation10_spill] sm:$0xff] }
  0xe6   : > { %747 = vrot.lane.b32.xlu0 %v4145_v50, %s2116_s21 }
  0xe7   : > { %v2891_v29 = vpop.permute.xlu1 %565 }
  0xe8   : > { %4146 = vst [vmem:[#allocation2_spill] sm:$0xff] %v2891_v29  ;;  %v2893_v26 = vpop.permute.xlu0 %563 }
  0xe9   : > { %4147 = vst [vmem:[#allocation83_spill] sm:$0xff] %v2893_v26  ;;  %753 = vrot.lane.b32.xlu1 %v4148_v57, %s2116_s21  ;;  %v4154_v26 = vld [vmem:[#allocation11_spill] sm:$0xff]  ;;  %v4155_v57 = vld [vmem:[#allocation12_spill] sm:$0xff] }
  0xea   : > { %751 = vrot.lane.b32.xlu0 %v4149_v13, %s2116_s21 }
  0xeb   : > { %v2899_v3 = vpop.permute.xlu1 %569 }
  0xec   : > { %4150 = vst [vmem:[#allocation84_spill] sm:$0xff] %v2899_v3  ;;  %v2901_v23 = vpop.permute.xlu0 %567 }
  0xed   : > { %4151 = vst [vmem:[#allocation85_spill] sm:$0xff] %v2901_v23  ;;  %757 = vrot.lane.b32.xlu1 %v4152_v61, %s2116_s21  ;;  %v4156_v23 = vld [vmem:[#allocation13_spill] sm:$0xff]  ;;  %v4157_v61 = vld [vmem:[#allocation14_spill] sm:$0xff] }
  0xee   : > { %755 = vrot.lane.b32.xlu0 %v4153_v62, %s2116_s21 }
  0xef   : > { %v2907_v50 = vpop.permute.xlu1 %573 }
  0xf0   : > { %v2909_v29 = vpop.permute.xlu0 %571 }
  0xf1   : > { %761 = vrot.lane.b32.xlu1 %v4154_v26, %s2116_s21 }
  0xf2   : > { %759 = vrot.lane.b32.xlu0 %v4155_v57, %s2116_s21 }
  0xf3   : > { %v2915_v13 = vpop.permute.xlu1 %577 }
  0xf4   : > { %v2917_v3 = vpop.permute.xlu0 %575 }
  0xf5   : > { %765 = vrot.lane.b32.xlu1 %v4156_v23, %s2116_s21 }
  0xf6   : > { %763 = vrot.lane.b32.xlu0 %v4157_v61, %s2116_s21 }
  0xf7   : > { %v2923_v62 = vpop.permute.xlu1 %581 }
  0xf8   : > { %v2925_v9 = vpop.permute.xlu0 %579 }
  0xf9   : > { %864 = vrot.lane.b32.xlu1 %v2623_v18, %s2117_s22 }
  0xfa   : > { %832 = vrot.lane.b32.xlu0 %v2519_v51, %s2117_s22 }
  0xfb   : > { %v2931_v26 = vpop.permute.xlu1 %585 }
  0xfc   : > { %v2933_v57 = vpop.permute.xlu0 %583 }
  0xfd   : > { %866 = vrot.lane.b32.xlu1 %v2618_v7, %s2117_s22 }
  0xfe   : > { %834 = vrot.lane.b32.xlu0 %v2514_v2, %s2117_s22  ;;  %v1497_v2 = vld [vmem:[%s3945_s1 + $0x20] sm:$0xf] }
  0xff   : > { %v2939_v23 = vpop.permute.xlu1 %589  ;;  %2000 = vmatprep.subr.msk.mxu0 %vm1602_vm2, %v1497_v2  ;;  %2058 = vmatprep.subr.msk.mxu1 %vm1602_vm2, %v1497_v2 }
 0x100   : > { %4158 = vst [vmem:[#allocation86_spill] sm:$0xff] %v2939_v23  ;;  %v2941_v61 = vpop.permute.xlu0 %587  ;;  %2001 = vmatpush3.msk.msra.mxu0 %vm1602_vm2, %v1497_v2  ;;  %2063 = vmatpush3.msk.msra.mxu1 %vm1602_vm2, %v1497_v2  ;;  %v1235_v23 = vsel %vm1229_vm3, %v2181_v11, %v2706_v21 }
 0x101   : > { %4159 = vst [vmem:[#allocation87_spill] sm:$0xff] %v2941_v61  ;;  %962 = vrot.lane.b32.xlu1 %v2364_v37, %s2118_s23 }
 0x102   : > { %930 = vrot.lane.b32.xlu0 %v2191_v15, %s2118_s23 }
 0x103   : > { %v2947_v51 = vpop.permute.xlu1 %593 }
 0x104   : > { %4160 = vst [vmem:[#allocation88_spill] sm:$0xff] %v2947_v51  ;;  %v2949_v18 = vpop.permute.xlu0 %591  ;;  %v4164_v51 = vld [vmem:[#allocation16_spill] sm:$0xff] }
 0x105   : > { %4161 = vst [vmem:[#allocation89_spill] sm:$0xff] %v2949_v18  ;;  %964 = vrot.lane.b32.xlu1 %v2358_v34, %s2118_s23  ;;  %v1496_v18 = vld [vmem:[%s3945_s1 + $0x18] sm:$0xff] }
 0x106   : > { %932 = vrot.lane.b32.xlu0 %v2181_v11, %s2118_s23  ;;  %2002 = vmatprep.subr.mxu0 %v1496_v18 }
 0x107   : > { %v2958_v7 = vpop.permute.xlu1 %631  ;;  %2059 = vmatprep.subr.mxu1 %v1496_v18  ;;  %2003 = vmatpush3.msra.mxu0 %v1496_v18 }
 0x108   : > { %4162 = vst [vmem:[#allocation90_spill] sm:$0xff] %v2958_v7  ;;  %v2960_v61 = vpop.permute.xlu0 %629  ;;  %v1495_v7 = vld [vmem:[%s3945_s1 + $0x10] sm:$0xff]  ;;  %2064 = vmatpush3.msra.mxu1 %v1496_v18  ;;  %v1493_v18 = vld [vmem:[%s3945_s1] sm:$0xff] }
 0x109   : > { %4163 = vst [vmem:[#allocation91_spill] sm:$0xff] %v2960_v61  ;;  %1064 = vrot.lane.b32.xlu1 %v4164_v51, %s2119_s28  ;;  %2004 = vmatprep.subr.mxu0 %v1495_v7 }
 0x10a   : > { %1032 = vrot.lane.b32.xlu0 %v2222_v28, %s2119_s28  ;;  %2060 = vmatprep.subr.mxu1 %v1495_v7  ;;  %v1494_v28 = vld [vmem:[%s3945_s1 + $0x8] sm:$0xff] }
 0x10b   : > { %v2972_v61 = vpop.permute.xlu1 %635  ;;  %2005 = vmatpush3.msra.mxu0 %v1495_v7  ;;  %2065 = vmatpush3.msra.mxu1 %v1495_v7 }
 0x10c   : > { %4165 = vst [vmem:[#allocation16_spill] sm:$0xff] %v2972_v61  ;;  %v2974_v2 = vpop.permute.xlu0 %633  ;;  %v1268_v61 = vsel %vm1262_vm4, %v1235_v23, %v2840_v27  ;;  %2006 = vmatprep.subr.mxu0 %v1494_v28  ;;  %2061 = vmatprep.subr.mxu1 %v1494_v28  ;;  %v1236_v23 = vsel %vm1229_vm3, %v2211_v24, %v2719_v39 }
 0x10d   : > { %4166 = vst [vmem:[#allocation92_spill] sm:$0xff] %v2974_v2  ;;  %1034 = vrot.lane.b32.xlu1 %v2217_v25, %s2119_s28  ;;  %v1234_v25 = vsel %vm1229_vm3, %v2191_v15, %v2711_v63  ;;  %2007 = vmatpush3.msra.mxu0 %v1494_v28  ;;  %v1237_v15 = vsel %vm1229_vm3, %v2205_v22, %v2717_v52 }
 0x10e   : > { %767 = vrot.lane.b32.xlu0 %v4164_v51, %s2116_s21  ;;  %v1267_v11 = vsel %vm1262_vm4, %v1234_v25, %v2845_v60  ;;  %2066 = vmatpush3.msra.mxu1 %v1494_v28  ;;  %v4167_v60 = vld [vmem:[#allocation15_spill] sm:$0xff]  ;;  %v1270_v27 = vsel %vm1262_vm4, %v1237_v15, %v2851_v16  ;;  %v1269_v63 = vsel %vm1262_vm4, %v1236_v23, %v2853_v31 }
 0x10f   : > { %v640_v2 = vpop.permute.xlu1 %639  ;;  %2008 = vmatprep.subr.mxu0 %v1493_v18  ;;  %2062 = vmatprep.subr.mxu1 %v1493_v18  ;;  %v1239_v39 = vsel %vm1229_vm3, %v2226_v30, %v2725_v6  ;;  %v1238_v31 = vsel %vm1229_vm3, %v2232_v32, %v2727_v45  ;;  %v1241_v32 = vsel %vm1229_vm3, %v2248_v38, %v2733_v4 }
 0x110   : > { %v2997_v7 = vsel %vm1295_vm5, %v1268_v61, %v640_v2  ;;  %v638_v21 = vpop.permute.xlu0 %637  ;;  %2009 = vmatpush3.msra.mxu0 %v1493_v18  ;;  %2067 = vmatpush3.msra.mxu1 %v1493_v18  ;;  %v1272_v16 = vsel %vm1262_vm4, %v1239_v39, %v2859_v8  ;;  %v1271_v25 = vsel %vm1262_vm4, %v1238_v31, %v2861_v49 }
 0x111   : > { %v3000_v51 = vsel %vm1295_vm5, %v1267_v11, %v638_v21  ;;  %1133 = vrot.lane.b32.xlu1 %v2532_v14, %s2120_s8  ;;  %v1240_v49 = vsel %vm1229_vm3, %v2254_v40, %v2735_v47  ;;  %v1274_v8 = vsel %vm1262_vm4, %v1241_v32, %v2867_v5  ;;  %v1243_v40 = vsel %vm1229_vm3, %v2270_v46, %v2741_v0  ;;  %v4178_v32 = vld [vmem:[#allocation18_spill] sm:$0xff] }
 0x112   : > { %1066 = vrot.lane.b32.xlu0 %v4167_v60, %s2119_s28  ;;  %v1273_v45 = vsel %vm1262_vm4, %v1240_v49, %v2869_v19  ;;  %v1276_v5 = vsel %vm1262_vm4, %v1243_v40, %v2875_v12 }
 0x113   : > { %v644_v61 = vpop.permute.xlu1 %643 }
 0x114   : > { %v3017_v2 = vsel %vm1295_vm5, %v1270_v27, %v644_v61  ;;  %v642_v52 = vpop.permute.xlu0 %641 }
 0x115   : > { %v3020_v28 = vsel %vm1295_vm5, %v1269_v63, %v642_v52  ;;  %769 = vrot.lane.b32.xlu1 %v4167_v60, %s2116_s21 }
 0x116   : > { %1165 = vrot.lane.b32.xlu0 %v2636_v35, %s2120_s8 }
 0x117   : > { %v648_v18 = vpop.permute.xlu1 %647 }
 0x118   : > { %v3037_v11 = vsel %vm1295_vm5, %v1272_v16, %v648_v18  ;;  %v646_v21 = vpop.permute.xlu0 %645  ;;  %v4173_v16 = vld [vmem:[#allocation36_spill] sm:$0xff]  ;;  %v4174_v18 = vld [vmem:[#allocation69_spill] sm:$0xff] }
 0x119   : > { %v3040_v30 = vsel %vm1295_vm5, %v1271_v25, %v646_v21  ;;  %868 = vrot.lane.b32.xlu1 %v2636_v35, %s2117_s22  ;;  %v4175_v25 = vld [vmem:[#allocation17_spill] sm:$0xff]  ;;  %v4177_v21 = vld [vmem:[#allocation70_spill] sm:$0xff] }
 0x11a   : > { %836 = vrot.lane.b32.xlu0 %v2532_v14, %s2117_s22  ;;  %v1242_v14 = vsel %vm1229_vm3, %v2276_v48, %v2743_v1  ;;  %v1245_v48 = vsel %vm1229_vm3, %v2292_v54, %v2749_v44  ;;  %v1250_v44 = vsel %vm1229_vm3, %v2364_v37, %v2775_v10 }
 0x11b   : > { %v652_v6 = vpop.permute.xlu1 %651  ;;  %v1275_v4 = vsel %vm1262_vm4, %v1242_v14, %v2877_v42  ;;  %v1244_v42 = vsel %vm1229_vm3, %v2298_v56, %v2751_v55  ;;  %v1278_v0 = vsel %vm1262_vm4, %v1245_v48, %v2883_v58  ;;  %v4170_v55 = vld [vmem:[#allocation20_spill] sm:$0xff]  ;;  %v1283_v61 = vsel %vm1262_vm4, %v1250_v44, %v2909_v29  ;;  %v4179_v14 = vld [vmem:[#allocation71_spill] sm:$0xff] }
 0x11c   : > { %v3057_v35 = vsel %vm1295_vm5, %v1274_v8, %v652_v6  ;;  %v650_v15 = vpop.permute.xlu0 %649  ;;  %v1277_v12 = vsel %vm1262_vm4, %v1244_v42, %v2885_v20 }
 0x11d   : > { %v3060_v38 = vsel %vm1295_vm5, %v1273_v45, %v650_v15  ;;  %1167 = vrot.lane.b32.xlu1 %v2631_v41, %s2120_s8 }
 0x11e   : > { %1135 = vrot.lane.b32.xlu0 %v2527_v43, %s2120_s8 }
 0x11f   : > { %v656_v47 = vpop.permute.xlu1 %655 }
 0x120   : > { %v3077_v19 = vsel %vm1295_vm5, %v1276_v5, %v656_v47  ;;  %v654_v60 = vpop.permute.xlu0 %653  ;;  %v4180_v5 = vld [vmem:[#allocation21_spill] sm:$0xff] }
 0x121   : > { %v3080_v46 = vsel %vm1295_vm5, %v1275_v4, %v654_v60  ;;  %870 = vrot.lane.b32.xlu1 %v2631_v41, %s2117_s22  ;;  %v1257_v47 = vsel %vm1229_vm3, %v4180_v5, %v4179_v14  ;;  %v4182_v4 = vld [vmem:[#allocation72_spill] sm:$0xff]  ;;  %v4183_v60 = vld [vmem:[#allocation22_spill] sm:$0xff] }
 0x122   : > { %838 = vrot.lane.b32.xlu0 %v2527_v43, %s2117_s22  ;;  %v1290_v48 = vsel %vm1262_vm4, %v1257_v47, %v2931_v26  ;;  %v4186_v26 = vld [vmem:[#allocation74_spill] sm:$0xff] }
 0x123   : > { %v660_v1 = vpop.permute.xlu1 %659 }
 0x124   : > { %v3097_v41 = vsel %vm1295_vm5, %v1278_v0, %v660_v1  ;;  %v658_v23 = vpop.permute.xlu0 %657 }
 0x125   : > { %4168 = vst [vmem:[#allocation15_spill] sm:$0xff] %v3097_v41  ;;  %v3100_v54 = vsel %vm1295_vm5, %v1277_v12, %v658_v23  ;;  %966 = vrot.lane.b32.xlu1 %v2386_v59, %s2118_s23  ;;  %v4216_v41 = vld [vmem:[#allocation91_spill] sm:$0xff] }
 0x126   : > { %4169 = vst [vmem:[#allocation93_spill] sm:$0xff] %v3100_v54  ;;  %934 = vrot.lane.b32.xlu0 %v2211_v24, %s2118_s23  ;;  %v1251_v24 = vsel %vm1229_vm3, %v2358_v34, %v2773_v36  ;;  %v4171_v36 = vld [vmem:[#allocation67_spill] sm:$0xff] }
 0x127   : > { %v3106_v56 = vpop.permute.xlu1 %663  ;;  %v1253_v37 = vsel %vm1229_vm3, %v2380_v53, %v4171_v36  ;;  %v4189_v36 = vld [vmem:[#allocation87_spill] sm:$0xff] }
 0x128   : > { %v3108_v43 = vpop.permute.xlu0 %661  ;;  %v1286_v10 = vsel %vm1262_vm4, %v1253_v37, %v2915_v13  ;;  %v4176_v13 = vld [vmem:[#allocation19_spill] sm:$0xff] }
 0x129   : > { %968 = vrot.lane.b32.xlu1 %v2380_v53, %s2118_s23  ;;  %v4218_v54 = vld [vmem:[#allocation55_spill] sm:$0xff] }
 0x12a   : > { %936 = vrot.lane.b32.xlu0 %v2205_v22, %s2118_s23  ;;  %v1284_v22 = vsel %vm1262_vm4, %v1251_v24, %v2907_v50  ;;  %v4172_v50 = vld [vmem:[#allocation68_spill] sm:$0xff]  ;;  %v4185_v24 = vld [vmem:[#allocation25_spill] sm:$0xff] }
 0x12b   : > { %v3114_v20 = vpop.permute.xlu1 %667  ;;  %v1252_v29 = vsel %vm1229_vm3, %v2386_v59, %v4172_v50  ;;  %v1255_v59 = vsel %vm1229_vm3, %v4175_v25, %v4174_v18  ;;  %v4193_v18 = vld [vmem:[#allocation35_spill] sm:$0xff] }
 0x12c   : > { %v3116_v58 = vpop.permute.xlu0 %665  ;;  %v1285_v39 = vsel %vm1262_vm4, %v1252_v29, %v2917_v3  ;;  %v1254_v3 = vsel %vm1229_vm3, %v4178_v32, %v4177_v21  ;;  %v1288_v49 = vsel %vm1262_vm4, %v1255_v59, %v2923_v62  ;;  %v4181_v62 = vld [vmem:[#allocation50_spill] sm:$0xff]  ;;  %v4194_v59 = vld [vmem:[#allocation76_spill] sm:$0xff] }
 0x12d   : > { %1068 = vrot.lane.b32.xlu1 %v4170_v55, %s2119_s28  ;;  %v1287_v6 = vsel %vm1262_vm4, %v1254_v3, %v2925_v9  ;;  %v1256_v9 = vsel %vm1229_vm3, %v4183_v60, %v4182_v4  ;;  %v4196_v3 = vld [vmem:[#allocation88_spill] sm:$0xff] }
 0x12e   : > { %1036 = vrot.lane.b32.xlu0 %v4141_v17, %s2119_s28  ;;  %v1289_v0 = vsel %vm1262_vm4, %v1256_v9, %v2933_v57 }
 0x12f   : > { %v672_v27 = vpop.permute.xlu1 %671 }
 0x130   : > { %v3133_v63 = vsel %vm1295_vm5, %v1284_v22, %v672_v27  ;;  %v670_v52 = vpop.permute.xlu0 %669  ;;  %v4187_v22 = vld [vmem:[#allocation26_spill] sm:$0xff] }
 0x131   : > { %v3136_v34 = vsel %vm1295_vm5, %v1283_v61, %v670_v52  ;;  %1038 = vrot.lane.b32.xlu1 %v2239_v33, %s2119_s28  ;;  %v1258_v57 = vsel %vm1229_vm3, %v4187_v22, %v4186_v26  ;;  %v4188_v27 = vld [vmem:[#allocation86_spill] sm:$0xff] }
 0x132   : > { %771 = vrot.lane.b32.xlu0 %v4170_v55, %s2116_s21  ;;  %v4184_v55 = vld [vmem:[#allocation73_spill] sm:$0xff]  ;;  %v1291_v37 = vsel %vm1262_vm4, %v1258_v57, %v4189_v36  ;;  %v4201_v57 = vld [vmem:[#allocation3_spill] sm:$0xff] }
 0x133   : > { %v676_v17 = vpop.permute.xlu1 %675  ;;  %v1259_v44 = vsel %vm1229_vm3, %v4185_v24, %v4184_v55 }
 0x134   : > { %v3153_v33 = vsel %vm1295_vm5, %v1286_v10, %v676_v17  ;;  %v674_v31 = vpop.permute.xlu0 %673  ;;  %v1292_v61 = vsel %vm1262_vm4, %v1259_v44, %v4188_v27  ;;  %v4190_v17 = vld [vmem:[#allocation49_spill] sm:$0xff]  ;;  %v4199_v44 = vld [vmem:[#allocation24_spill] sm:$0xff] }
 0x135   : > { %v3156_v53 = vsel %vm1295_vm5, %v1285_v39, %v674_v31  ;;  %1137 = vrot.lane.b32.xlu1 %v4173_v16, %s2120_s8  ;;  %v4191_v39 = vld [vmem:[#allocation75_spill] sm:$0xff]  ;;  %v4192_v31 = vld [vmem:[#allocation29_spill] sm:$0xff] }
 0x136   : > { %1070 = vrot.lane.b32.xlu0 %v4176_v13, %s2119_s28 }
 0x137   : > { %v680_v8 = vpop.permute.xlu1 %679 }
 0x138   : > { %v3173_v45 = vsel %vm1295_vm5, %v1288_v49, %v680_v8  ;;  %v678_v15 = vpop.permute.xlu0 %677 }
 0x139   : > { %v3176_v40 = vsel %vm1295_vm5, %v1287_v6, %v678_v15  ;;  %773 = vrot.lane.b32.xlu1 %v4176_v13, %s2116_s21  ;;  %v4195_v13 = vld [vmem:[#allocation30_spill] sm:$0xff]  ;;  %v4197_v6 = vld [vmem:[#allocation89_spill] sm:$0xff] }
 0x13a   : > { %1169 = vrot.lane.b32.xlu0 %v4181_v62, %s2120_s8  ;;  %v1260_v21 = vsel %vm1229_vm3, %v4195_v13, %v4194_v59  ;;  %v4208_v59 = vld [vmem:[#allocation37_spill] sm:$0xff] }
 0x13b   : > { %v684_v42 = vpop.permute.xlu1 %683  ;;  %v1293_v15 = vsel %vm1262_vm4, %v1260_v21, %v4197_v6 }
 0x13c   : > { %v3193_v1 = vsel %vm1295_vm5, %v1290_v48, %v684_v42  ;;  %v682_v12 = vpop.permute.xlu0 %681  ;;  %v2085_v48 = vld [vmem:[%s2155_s17 + $0x60] sm:$0xff] }
 0x13d   : > { %v3196_v23 = vsel %vm1295_vm5, %v1289_v0, %v682_v12  ;;  %872 = vrot.lane.b32.xlu1 %v4181_v62, %s2117_s22  ;;  %v2086_v12 = vld [vmem:[%s2155_s17 + $0x68] sm:$0xff] }
 0x13e   : > { %840 = vrot.lane.b32.xlu0 %v4173_v16, %s2117_s22  ;;  %v1261_v16 = vsel %vm1229_vm3, %v4192_v31, %v4191_v39 }
 0x13f   : > { %v688_v52 = vpop.permute.xlu1 %687  ;;  %v1294_v49 = vsel %vm1262_vm4, %v1261_v16, %v4196_v3 }
 0x140   : > { %v3213_v50 = vsel %vm1295_vm5, %v1292_v61, %v688_v52  ;;  %v686_v29 = vpop.permute.xlu0 %685  ;;  %v4202_v61 = vld [vmem:[#allocation38_spill] sm:$0xff]  ;;  %v4203_v52 = vld [vmem:[#allocation23_spill] sm:$0xff] }
 0x141   : > { %v3216_v10 = vsel %vm1295_vm5, %v1291_v37, %v686_v29  ;;  %1171 = vrot.lane.b32.xlu1 %v4190_v17, %s2120_s8  ;;  %v4204_v29 = vld [vmem:[#allocation52_spill] sm:$0xff] }
 0x142   : > { %1139 = vrot.lane.b32.xlu0 %v4193_v18, %s2120_s8 }
 0x143   : > { %v692_v8 = vpop.permute.xlu1 %691 }
 0x144   : > { %v3233_v14 = vsel %vm1295_vm5, %v1294_v49, %v692_v8  ;;  %v690_v47 = vpop.permute.xlu0 %689  ;;  %v2087_v8 = vld [vmem:[%s2155_s17 + $0x78] sm:$0xff] }
 0x145   : > { %4198 = vst [vmem:[#allocation20_spill] sm:$0xff] %v3233_v14  ;;  %v3236_v62 = vsel %vm1295_vm5, %v1293_v15, %v690_v47  ;;  %874 = vrot.lane.b32.xlu1 %v4190_v17, %s2117_s22  ;;  %v2088_v47 = vld [vmem:[%s2155_s17 + $0x80] sm:$0xff] }
 0x146   : > { %842 = vrot.lane.b32.xlu0 %v4193_v18, %s2117_s22  ;;  %v4207_v18 = vld [vmem:[#allocation51_spill] sm:$0xff] }
 0x147   : > { %v3242_v4 = vpop.permute.xlu1 %733 }
 0x148   : > { %v3244_v9 = vpop.permute.xlu0 %731 }
 0x149   : > { %970 = vrot.lane.b32.xlu1 %v4178_v32, %s2118_s23  ;;  %v4200_v32 = vld [vmem:[#allocation4_spill] sm:$0xff] }
 0x14a   : > { %938 = vrot.lane.b32.xlu0 %v2085_v48, %s2118_s23 }
 0x14b   : > { %v3250_v42 = vpop.permute.xlu1 %737 }
 0x14c   : > { %v3252_v0 = vpop.permute.xlu0 %735 }
 0x14d   : > { %972 = vrot.lane.b32.xlu1 %v4175_v25, %s2118_s23 }
 0x14e   : > { %940 = vrot.lane.b32.xlu0 %v2086_v12, %s2118_s23 }
 0x14f   : > { %v3258_v55 = vpop.permute.xlu1 %741 }
 0x150   : > { %v3260_v24 = vpop.permute.xlu0 %739 }
 0x151   : > { %1072 = vrot.lane.b32.xlu1 %v4199_v44, %s2119_s28 }
 0x152   : > { %1040 = vrot.lane.b32.xlu0 %v4200_v32, %s2119_s28 }
 0x153   : > { %v3266_v26 = vpop.permute.xlu1 %745 }
 0x154   : > { %v3268_v22 = vpop.permute.xlu0 %743 }
 0x155   : > { %1042 = vrot.lane.b32.xlu1 %v4201_v57, %s2119_s28 }
 0x156   : > { %775 = vrot.lane.b32.xlu0 %v4199_v44, %s2116_s21  ;;  %v4209_v44 = vld [vmem:[#allocation28_spill] sm:$0xff] }
 0x157   : > { %v3274_v25 = vpop.permute.xlu1 %749 }
 0x158   : > { %v3276_v27 = vpop.permute.xlu0 %747 }
 0x159   : > { %1141 = vrot.lane.b32.xlu1 %v4202_v61, %s2120_s8 }
 0x15a   : > { %1074 = vrot.lane.b32.xlu0 %v4203_v52, %s2119_s28 }
 0x15b   : > { %v3282_v36 = vpop.permute.xlu1 %753 }
 0x15c   : > { %v3284_v37 = vpop.permute.xlu0 %751 }
 0x15d   : > { %777 = vrot.lane.b32.xlu1 %v4203_v52, %s2116_s21 }
 0x15e   : > { %1173 = vrot.lane.b32.xlu0 %v4204_v29, %s2120_s8 }
 0x15f   : > { %v3290_v17 = vpop.permute.xlu1 %757 }
 0x160   : > { %v3292_v39 = vpop.permute.xlu0 %755 }
 0x161   : > { %876 = vrot.lane.b32.xlu1 %v4204_v29, %s2117_s22  ;;  %v2089_v29 = vld [vmem:[%s2155_s17] sm:$0xff] }
 0x162   : > { %844 = vrot.lane.b32.xlu0 %v4202_v61, %s2117_s22  ;;  %v4211_v61 = vld [vmem:[#allocation5_spill] sm:$0xff] }
 0x163   : > { %v3298_v31 = vpop.permute.xlu1 %761 }
 0x164   : > { %4205 = vst [vmem:[#allocation67_spill] sm:$0xff] %v3298_v31  ;;  %v3300_v16 = vpop.permute.xlu0 %759 }
 0x165   : > { %4206 = vst [vmem:[#allocation68_spill] sm:$0xff] %v3300_v16  ;;  %1175 = vrot.lane.b32.xlu1 %v4207_v18, %s2120_s8 }
 0x166   : > { %1143 = vrot.lane.b32.xlu0 %v4208_v59, %s2120_s8 }
 0x167   : > { %v3306_v13 = vpop.permute.xlu1 %765 }
 0x168   : > { %v764_v21 = vpop.permute.xlu0 %763 }
 0x169   : > { %878 = vrot.lane.b32.xlu1 %v4207_v18, %s2117_s22  ;;  %v4212_v18 = vld [vmem:[#allocation56_spill] sm:$0xff] }
 0x16a   : > { %846 = vrot.lane.b32.xlu0 %v4208_v59, %s2117_s22  ;;  %v1230_v59 = vsel %vm1229_vm3, %v2089_v29, %v4212_v18 }
 0x16b   : > { %v865_v3 = vpop.permute.xlu1 %864 }
 0x16c   : > { %v833_v49 = vpop.permute.xlu0 %832 }
 0x16d   : > { %974 = vrot.lane.b32.xlu1 %v4183_v60, %s2118_s23  ;;  %v4210_v60 = vld [vmem:[#allocation6_spill] sm:$0xff] }
 0x16e   : > { %942 = vrot.lane.b32.xlu0 %v2087_v8, %s2118_s23  ;;  %v4213_v8 = vld [vmem:[#allocation40_spill] sm:$0xff] }
 0x16f   : > { %v3316_v6 = vpop.permute.xlu1 %866 }
 0x170   : > { %v3318_v15 = vpop.permute.xlu0 %834 }
 0x171   : > { %976 = vrot.lane.b32.xlu1 %v4180_v5, %s2118_s23 }
 0x172   : > { %944 = vrot.lane.b32.xlu0 %v2088_v47, %s2118_s23  ;;  %v4214_v47 = vld [vmem:[#allocation78_spill] sm:$0xff] }
 0x173   : > { %v963_v48 = vpop.permute.xlu1 %962 }
 0x174   : > { %v931_v12 = vpop.permute.xlu0 %930 }
 0x175   : > { %1076 = vrot.lane.b32.xlu1 %v4209_v44, %s2119_s28 }
 0x176   : > { %1044 = vrot.lane.b32.xlu0 %v4210_v60, %s2119_s28  ;;  %v1263_v60 = vsel %vm1262_vm4, %v1230_v59, %v4214_v47  ;;  %v3353_v59 = vld [vmem:[%s2155_s17 + $0xc0] sm:$0xff]  ;;  %v4217_v47 = vld [vmem:[#allocation64_spill] sm:$0xff] }
 0x177   : > { %v965_v32 = vpop.permute.xlu1 %964 }
 0x178   : > { %v3328_v57 = vpop.permute.xlu0 %932 }
 0x179   : > { %1046 = vrot.lane.b32.xlu1 %v4211_v61, %s2119_s28  ;;  %v4215_v61 = vld [vmem:[#allocation27_spill] sm:$0xff] }
 0x17a   : > { %779 = vrot.lane.b32.xlu0 %v4209_v44, %s2116_s21  ;;  %v1296_v44 = vsel %vm1295_vm5, %v1263_v60, %v4216_v41  ;;  %v1246_v41 = vsel %vm1229_vm3, %v3353_v59, %v4217_v47 }
 0x17b   : > { %v1065_v5 = vpop.permute.xlu1 %1064  ;;  %v1329_v14 = vsel %vm1328_vm6, %v1296_v44, %v3244_v9  ;;  %v4219_v9 = vld [vmem:[#allocation83_spill] sm:$0xff] }
 0x17c   : > { %v1033_v52 = vpop.permute.xlu0 %1032  ;;  %v1362_v18 = vsel %vm1361_vm7, %v1329_v14, %v833_v49  ;;  %v1279_v14 = vsel %vm1262_vm4, %v1246_v41, %v4219_v9  ;;  %v3379_v9 = vld [vmem:[%s2155_s17 + $0xc8] sm:$0xff] }
 0x17d   : > { %1145 = vrot.lane.b32.xlu1 %v4213_v8, %s2120_s8  ;;  %v1395_v60 = vsel %vm1394_vm8, %v1362_v18, %v931_v12  ;;  %v1312_v44 = vsel %vm1295_vm5, %v1279_v14, %v3108_v43  ;;  %v4221_v14 = vld [vmem:[#allocation53_spill] sm:$0xff] }
 0x17e   : > { %1078 = vrot.lane.b32.xlu0 %v4215_v61, %s2119_s28  ;;  %v1428_v49 = vsel %vm1427_vm9, %v1395_v60, %v1033_v52  ;;  %v1345_v12 = vsel %vm1328_vm6, %v1312_v44, %v764_v21  ;;  %v4220_v21 = vld [vmem:[#allocation63_spill] sm:$0xff] }
 0x17f   : > { %v1035_v31 = vpop.permute.xlu1 %1034  ;;  %v1378_v18 = vsel %vm1361_vm7, %v1345_v12, %v865_v3 }
 0x180   : > { %v3347_v29 = vpop.permute.xlu0 %767  ;;  %v1411_v52 = vsel %vm1394_vm8, %v1378_v18, %v963_v48 }
 0x181   : > { %781 = vrot.lane.b32.xlu1 %v4215_v61, %s2116_s21  ;;  %v1444_v43 = vsel %vm1427_vm9, %v1411_v52, %v1065_v5  ;;  %v4224_v5 = vld [vmem:[#allocation39_spill] sm:$0xff] }
 0x182   : > { %1177 = vrot.lane.b32.xlu0 %v4218_v54, %s2120_s8 }
 0x183   : > { %v1134_v61 = vpop.permute.xlu1 %1133 }
 0x184   : > { %v1067_v16 = vpop.permute.xlu0 %1066  ;;  %v1461_v47 = vsel %vm1460_vm10, %v1428_v49, %v1134_v61  ;;  %v2092_v49 = vld [vmem:[%s2155_s17 + $0x8] sm:$0xff]  ;;  %v4223_v61 = vld [vmem:[#allocation2_spill] sm:$0xff] }
 0x185   : > { %880 = vrot.lane.b32.xlu1 %v4218_v54, %s2117_s22  ;;  %2010 = vmatprep.mubr.msk.f32.mxu0 %vm1505_vm11, %v1461_v47  ;;  %v1247_v54 = vsel %vm1229_vm3, %v3379_v9, %v4220_v21  ;;  %v4225_v47 = vld [vmem:[#allocation77_spill] sm:$0xff] }
 0x186   : > { %848 = vrot.lane.b32.xlu0 %v4213_v8, %s2117_s22  ;;  %v4222_v8 = vld [vmem:[#allocation60_spill] sm:$0xff]  ;;  %v1280_v44 = vsel %vm1262_vm4, %v1247_v54, %v4223_v61 }
 0x187   : > { %v3375_v41 = vpop.permute.xlu1 %769  ;;  %v1231_v48 = vsel %vm1229_vm3, %v2092_v49, %v4222_v8  ;;  %v1313_v18 = vsel %vm1295_vm5, %v1280_v44, %v3106_v56  ;;  %v2093_v44 = vld [vmem:[%s2155_s17 + $0x150] sm:$0xff] }
 0x188   : > { %v1166_v60 = vpop.permute.xlu0 %1165  ;;  %v1264_v12 = vsel %vm1262_vm4, %v1231_v48, %v4225_v47  ;;  %v1346_v21 = vsel %vm1328_vm6, %v1313_v18, %v3306_v13  ;;  %v4227_v18 = vld [vmem:[#allocation32_spill] sm:$0xff] }
 0x189   : > { %1179 = vrot.lane.b32.xlu1 %v4221_v14, %s2120_s8  ;;  %v1477_v3 = vsel %vm1460_vm10, %v1444_v43, %v1166_v60  ;;  %v4226_v43 = vld [vmem:[#allocation90_spill] sm:$0xff] }
 0x18a   : > { %1147 = vrot.lane.b32.xlu0 %v4224_v5, %s2120_s8  ;;  %2034 = vmatprep.mubr.msk.f32.mxu1 %vm1505_vm11, %v1477_v3  ;;  %v1297_v60 = vsel %vm1295_vm5, %v1264_v12, %v4226_v43  ;;  %v1379_v3 = vsel %vm1361_vm7, %v1346_v21, %v3316_v6  ;;  %v4228_v43 = vld [vmem:[#allocation8_spill] sm:$0xff] }
 0x18b   : > { %v3399_v52 = vpop.permute.xlu1 %868  ;;  %v1330_v49 = vsel %vm1328_vm6, %v1297_v60, %v3242_v4  ;;  %v1412_v8 = vsel %vm1394_vm8, %v1379_v3, %v965_v32  ;;  %v2094_v32 = vld [vmem:[%s2155_s17 + $0x90] sm:$0xff] }
 0x18c   : > { %v837_v54 = vpop.permute.xlu0 %836  ;;  %v1363_v56 = vsel %vm1361_vm7, %v1330_v49, %v3318_v15  ;;  %v1445_v4 = vsel %vm1427_vm9, %v1412_v8, %v1067_v16  ;;  %v4229_v49 = vld [vmem:[#allocation7_spill] sm:$0xff]  ;;  %v2097_v8 = vld [vmem:[%s2155_s17 + $0x18] sm:$0xff] }
 0x18d   : > { %882 = vrot.lane.b32.xlu1 %v4221_v14, %s2117_s22  ;;  %v1396_v13 = vsel %vm1394_vm8, %v1363_v56, %v3328_v57 }
 0x18e   : > { %850 = vrot.lane.b32.xlu0 %v4224_v5, %s2117_s22  ;;  %v1429_v6 = vsel %vm1427_vm9, %v1396_v13, %v1035_v31  ;;  %v2095_v31 = vld [vmem:[%s2155_s17 + $0x158] sm:$0xff]  ;;  %v4230_v13 = vld [vmem:[#allocation54_spill] sm:$0xff] }
 0x18f   : > { %v1168_v48 = vpop.permute.xlu1 %1167  ;;  %v2096_v5 = vld [vmem:[%s2155_s17 + $0x98] sm:$0xff] }
 0x190   : > { %v1478_v14 = vsel %vm1460_vm10, %v1445_v4, %v1168_v48  ;;  %v1136_v61 = vpop.permute.xlu0 %1135  ;;  %v1232_v4 = vsel %vm1229_vm3, %v2097_v8, %v4230_v13  ;;  %v4231_v48 = vld [vmem:[#allocation42_spill] sm:$0xff] }
 0x191   : > { %v1462_v15 = vsel %vm1460_vm10, %v1429_v6, %v1136_v61  ;;  %978 = vrot.lane.b32.xlu1 %v2093_v44, %s2118_s23  ;;  %2035 = vmatmul.mubr.msk.f32.vlgmr.msra.gmra.mxu1 %vm1505_vm11, %v1478_v14  ;;  %v4232_v6 = vld [vmem:[#allocation80_spill] sm:$0xff]  ;;  %v4233_v61 = vld [vmem:[#allocation31_spill] sm:$0xff] }
 0x192   : > { %946 = vrot.lane.b32.xlu0 %v2094_v32, %s2118_s23  ;;  %2011 = vmatmul.mubr.msk.f32.vlgmr.msra.gmra.mxu0 %vm1505_vm11, %v1462_v15  ;;  %v1265_v14 = vsel %vm1262_vm4, %v1232_v4, %v4232_v6  ;;  %v4234_v15 = vld [vmem:[#allocation92_spill] sm:$0xff]  ;;  %v4236_v4 = vld [vmem:[#allocation59_spill] sm:$0xff]  ;;  %v4237_v6 = vld [vmem:[#allocation85_spill] sm:$0xff] }
 0x193   : > { %v3428_v16 = vpop.permute.xlu1 %870  ;;  %v1298_v44 = vsel %vm1295_vm5, %v1265_v14, %v4234_v15 }
 0x194   : > { %v3430_v57 = vpop.permute.xlu0 %838 }
 0x195   : > { %980 = vrot.lane.b32.xlu1 %v2095_v31, %s2118_s23  ;;  %v1331_v31 = vsel %vm1328_vm6, %v1298_v44, %v3252_v0 }
 0x196   : > { %948 = vrot.lane.b32.xlu0 %v2096_v5, %s2118_s23 }
 0x197   : > { %v967_v47 = vpop.permute.xlu1 %966 }
 0x198   : > { %v935_v12 = vpop.permute.xlu0 %934 }
 0x199   : > { %1080 = vrot.lane.b32.xlu1 %v4227_v18, %s2119_s28 }
 0x19a   : > { %1048 = vrot.lane.b32.xlu0 %v4228_v43, %s2119_s28  ;;  %v3463_v43 = vld [vmem:[%s2155_s17 + $0xd8] sm:$0xff] }
 0x19b   : > { %v969_v60 = vpop.permute.xlu1 %968 }
 0x19c   : > { %v937_v21 = vpop.permute.xlu0 %936 }
 0x19d   : > { %1050 = vrot.lane.b32.xlu1 %v4229_v49, %s2119_s28  ;;  %v4235_v49 = vld [vmem:[#allocation66_spill] sm:$0xff] }
 0x19e   : > { %783 = vrot.lane.b32.xlu0 %v4227_v18, %s2116_s21  ;;  %v1364_v18 = vsel %vm1361_vm7, %v1331_v31, %v837_v54  ;;  %v1248_v8 = vsel %vm1229_vm3, %v3463_v43, %v4235_v49 }
 0x19f   : > { %v1069_v3 = vpop.permute.xlu1 %1068  ;;  %v1397_v13 = vsel %vm1394_vm8, %v1364_v18, %v935_v12  ;;  %v1281_v0 = vsel %vm1262_vm4, %v1248_v8, %v4237_v6  ;;  %v3491_v8 = vld [vmem:[%s2155_s17 + $0xe0] sm:$0xff] }
 0x1a0   : > { %v1037_v56 = vpop.permute.xlu0 %1036  ;;  %v2100_v6 = vld [vmem:[%s2155_s17 + $0x20] sm:$0xff] }
 0x1a1   : > { %1149 = vrot.lane.b32.xlu1 %v4231_v48, %s2120_s8  ;;  %v1430_v54 = vsel %vm1427_vm9, %v1397_v13, %v1037_v56 }
 0x1a2   : > { %1082 = vrot.lane.b32.xlu0 %v4233_v61, %s2119_s28 }
 0x1a3   : > { %v1039_v32 = vpop.permute.xlu1 %1038 }
 0x1a4   : > { %v3457_v5 = vpop.permute.xlu0 %771 }
 0x1a5   : > { %785 = vrot.lane.b32.xlu1 %v4233_v61, %s2116_s21  ;;  %v1314_v61 = vsel %vm1295_vm5, %v1281_v0, %v3116_v58  ;;  %v4241_v0 = vld [vmem:[#allocation84_spill] sm:$0xff] }
 0x1a6   : > { %1181 = vrot.lane.b32.xlu0 %v4236_v4, %s2120_s8  ;;  %v1347_v12 = vsel %vm1328_vm6, %v1314_v61, %v3347_v29  ;;  %v4238_v29 = vld [vmem:[#allocation65_spill] sm:$0xff] }
 0x1a7   : > { %v1138_v14 = vpop.permute.xlu1 %1137  ;;  %v1380_v31 = vsel %vm1361_vm7, %v1347_v12, %v3399_v52  ;;  %v1249_v13 = vsel %vm1229_vm3, %v3491_v8, %v4238_v29  ;;  %v4239_v52 = vld [vmem:[#allocation57_spill] sm:$0xff] }
 0x1a8   : > { %v1463_v15 = vsel %vm1460_vm10, %v1430_v54, %v1138_v14  ;;  %v1071_v44 = vpop.permute.xlu0 %1070  ;;  %v1413_v58 = vsel %vm1394_vm8, %v1380_v31, %v967_v47  ;;  %v1282_v54 = vsel %vm1262_vm4, %v1249_v13, %v4241_v0  ;;  %v4243_v14 = vld [vmem:[#allocation79_spill] sm:$0xff]  ;;  %v4244_v31 = vld [vmem:[#allocation16_spill] sm:$0xff] }
 0x1a9   : > { %884 = vrot.lane.b32.xlu1 %v4236_v4, %s2117_s22  ;;  %2013 = vmatprep.mubr.msk.f32.mxu0 %vm1505_vm11, %v1463_v15  ;;  %v1446_v18 = vsel %vm1427_vm9, %v1413_v58, %v1069_v3  ;;  %v4242_v3 = vld [vmem:[#allocation41_spill] sm:$0xff]  ;;  %v1315_v15 = vsel %vm1295_vm5, %v1282_v54, %v3114_v20  ;;  %v2103_v0 = vld [vmem:[%s2155_s17 + $0x170] sm:$0xff] }
 0x1aa   : > { %852 = vrot.lane.b32.xlu0 %v4231_v48, %s2117_s22  ;;  %v4240_v48 = vld [vmem:[#allocation58_spill] sm:$0xff] }
 0x1ab   : > { %v3487_v56 = vpop.permute.xlu1 %773  ;;  %v1233_v47 = vsel %vm1229_vm3, %v2100_v6, %v4240_v48 }
 0x1ac   : > { %v1170_v49 = vpop.permute.xlu0 %1169  ;;  %v1266_v61 = vsel %vm1262_vm4, %v1233_v47, %v4243_v14  ;;  %v4245_v14 = vld [vmem:[#allocation34_spill] sm:$0xff] }
 0x1ad   : > { %v1479_v4 = vsel %vm1460_vm10, %v1446_v18, %v1170_v49  ;;  %1183 = vrot.lane.b32.xlu1 %v4239_v52, %s2120_s8  ;;  %v1299_v58 = vsel %vm1295_vm5, %v1266_v61, %v4244_v31  ;;  %v1348_v18 = vsel %vm1328_vm6, %v1315_v15, %v3375_v41  ;;  %v4246_v61 = vld [vmem:[#allocation10_spill] sm:$0xff] }
 0x1ae   : > { %1151 = vrot.lane.b32.xlu0 %v4242_v3, %s2120_s8  ;;  %2037 = vmatprep.mubr.msk.f32.mxu1 %vm1505_vm11, %v1479_v4  ;;  %v1332_v29 = vsel %vm1328_vm6, %v1299_v58, %v3250_v42  ;;  %v1381_v13 = vsel %vm1361_vm7, %v1348_v18, %v3428_v16  ;;  %v4247_v58 = vld [vmem:[#allocation9_spill] sm:$0xff] }
 0x1af   : > { %v873_v12 = vpop.permute.xlu1 %872  ;;  %v1365_v20 = vsel %vm1361_vm7, %v1332_v29, %v3430_v57  ;;  %v1414_v4 = vsel %vm1394_vm8, %v1381_v13, %v969_v60  ;;  %v2101_v57 = vld [vmem:[%s2155_s17 + $0x168] sm:$0xff]  ;;  %v4248_v13 = vld [vmem:[#allocation44_spill] sm:$0xff] }
 0x1b0   : > { %v841_v49 = vpop.permute.xlu0 %840  ;;  %v1398_v41 = vsel %vm1394_vm8, %v1365_v20, %v937_v21  ;;  %v1447_v42 = vsel %vm1427_vm9, %v1414_v4, %v1071_v44  ;;  %v2102_v60 = vld [vmem:[%s2155_s17 + $0xa8] sm:$0xff]  ;;  %v4249_v20 = vld [vmem:[#allocation33_spill] sm:$0xff] }
 0x1b1   : > { %886 = vrot.lane.b32.xlu1 %v4239_v52, %s2117_s22  ;;  %v1431_v16 = vsel %vm1427_vm9, %v1398_v41, %v1039_v32  ;;  %v2104_v32 = vld [vmem:[%s2155_s17 + $0xb0] sm:$0xff]  ;;  %v1333_v41 = vsel %vm1328_vm6, %v3000_v51, %v3260_v24  ;;  %v1349_v51 = vsel %vm1328_vm6, %v3136_v34, %v3457_v5  ;;  %v4251_v34 = vld [vmem:[#allocation61_spill] sm:$0xff]  ;;  %v4252_v5 = vld [vmem:[#allocation43_spill] sm:$0xff] }
 0x1b2   : > { %854 = vrot.lane.b32.xlu0 %v4242_v3, %s2117_s22  ;;  %v1382_v24 = vsel %vm1361_vm7, %v1349_v51, %v873_v12 }
 0x1b3   : > { %v1172_v6 = vpop.permute.xlu1 %1171 }
 0x1b4   : > { %v1480_v48 = vsel %vm1460_vm10, %v1447_v42, %v1172_v6  ;;  %v1140_v52 = vpop.permute.xlu0 %1139  ;;  %v1366_v6 = vsel %vm1361_vm7, %v1333_v41, %v841_v49 }
 0x1b5   : > { %v1464_v47 = vsel %vm1460_vm10, %v1431_v16, %v1140_v52  ;;  %982 = vrot.lane.b32.xlu1 %v2101_v57, %s2118_s23  ;;  %2038 = vmatmul.mubr.msk.f32.gmra.mxu1 %vm1505_vm11, %v1480_v48  ;;  %v4250_v48 = vld [vmem:[#allocation62_spill] sm:$0xff] }
 0x1b6   : > { %950 = vrot.lane.b32.xlu0 %v2102_v60, %s2118_s23  ;;  %2014 = vmatmul.mubr.msk.f32.gmra.mxu0 %vm1505_vm11, %v1464_v47 }
 0x1b7   : > { %v875_v21 = vpop.permute.xlu1 %874 }
 0x1b8   : > { %v843_v44 = vpop.permute.xlu0 %842 }
 0x1b9   : > { %984 = vrot.lane.b32.xlu1 %v2103_v0, %s2118_s23 }
 0x1ba   : > { %952 = vrot.lane.b32.xlu0 %v2104_v32, %s2118_s23 }
 0x1bb   : > { %v971_v54 = vpop.permute.xlu1 %970 }
 0x1bc   : > { %v939_v3 = vpop.permute.xlu0 %938  ;;  %v1415_v49 = vsel %vm1394_vm8, %v1382_v24, %v971_v54  ;;  %v1350_v54 = vsel %vm1328_vm6, %v3133_v63, %v3487_v56 }
 0x1bd   : > { %1084 = vrot.lane.b32.xlu1 %v4245_v14, %s2119_s28  ;;  %v1399_v16 = vsel %vm1394_vm8, %v1366_v6, %v939_v3 }
 0x1be   : > { %1052 = vrot.lane.b32.xlu0 %v4246_v61, %s2119_s28 }
 0x1bf   : > { %v973_v15 = vpop.permute.xlu1 %972 }
 0x1c0   : > { %v941_v31 = vpop.permute.xlu0 %940 }
 0x1c1   : > { %1054 = vrot.lane.b32.xlu1 %v4247_v58, %s2119_s28  ;;  %v1334_v58 = vsel %vm1328_vm6, %v2997_v7, %v3258_v55 }
 0x1c2   : > { %787 = vrot.lane.b32.xlu0 %v4245_v14, %s2116_s21 }
 0x1c3   : > { %v1073_v18 = vpop.permute.xlu1 %1072 }
 0x1c4   : > { %v1041_v29 = vpop.permute.xlu0 %1040  ;;  %v1448_v32 = vsel %vm1427_vm9, %v1415_v49, %v1073_v18  ;;  %v1383_v18 = vsel %vm1361_vm7, %v1350_v54, %v875_v21  ;;  %v4256_v49 = vld [vmem:[#allocation11_spill] sm:$0xff] }
 0x1c5   : > { %1153 = vrot.lane.b32.xlu1 %v4248_v13, %s2120_s8  ;;  %v1432_v52 = vsel %vm1427_vm9, %v1399_v16, %v1041_v29  ;;  %v1367_v29 = vsel %vm1361_vm7, %v1334_v58, %v843_v44  ;;  %v4253_v44 = vld [vmem:[#allocation82_spill] sm:$0xff] }
 0x1c6   : > { %1086 = vrot.lane.b32.xlu0 %v4249_v20, %s2119_s28 }
 0x1c7   : > { %v1043_v4 = vpop.permute.xlu1 %1042 }
 0x1c8   : > { %v3556_v42 = vpop.permute.xlu0 %775 }
 0x1c9   : > { %789 = vrot.lane.b32.xlu1 %v4249_v20, %s2116_s21  ;;  %v1400_v20 = vsel %vm1394_vm8, %v1367_v29, %v941_v31  ;;  %v726_v31 = vrot.slane %v4253_v44, 1 }
 0x1ca   : > { %1185 = vrot.lane.b32.xlu0 %v4250_v48, %s2120_s8  ;;  %v1433_v41 = vsel %vm1427_vm9, %v1400_v20, %v1043_v4 }
 0x1cb   : > { %v1142_v47 = vpop.permute.xlu1 %1141 }
 0x1cc   : > { %v1465_v57 = vsel %vm1460_vm10, %v1432_v52, %v1142_v47  ;;  %v1075_v60 = vpop.permute.xlu0 %1074 }
 0x1cd   : > { %888 = vrot.lane.b32.xlu1 %v4250_v48, %s2117_s22  ;;  %2016 = vmatprep.mubr.msk.f32.mxu0 %vm1505_vm11, %v1465_v57  ;;  %v221_v57 = vld [vmem:[%s2155_s17 + $0x190] sm:$0x3] }
 0x1ce   : > { %856 = vrot.lane.b32.xlu0 %v4248_v13, %s2117_s22  ;;  %v1416_v13 = vsel %vm1394_vm8, %v1383_v18, %v973_v15  ;;  %v4254_v15 = vld [vmem:[#allocation81_spill] sm:$0xff]  ;;  %v729_v51 = vrot.slane %v221_v57, 1  ;;  %v1335_v18 = vsel %vm1328_vm6, %v3020_v28, %v3268_v22  ;;  %v1351_v28 = vsel %vm1328_vm6, %v3156_v53, %v3556_v42 }
 0x1cf   : > { %v3576_v0 = vpop.permute.xlu1 %777  ;;  %v1449_v63 = vsel %vm1427_vm9, %v1416_v13, %v1075_v60  ;;  %v727_v6 = vrot.slane %v4254_v15, 1  ;;  %v4255_v60 = vld [vmem:[#allocation12_spill] sm:$0xff]  ;;  %v4258_v42 = vld [vmem:[#allocation45_spill] sm:$0xff] }
 0x1d0   : > { %v1174_v3 = vpop.permute.xlu0 %1173 }
 0x1d1   : > { %v1481_v14 = vsel %vm1460_vm10, %v1448_v32, %v1174_v3  ;;  %1187 = vrot.lane.b32.xlu1 %v4251_v34, %s2120_s8  ;;  %v728_v48 = vsel %vm273_vm0, %v726_v31, %v727_v6  ;;  %v827_v32 = vrot.slane %v4253_v44, 2  ;;  %v1352_v31 = vsel %vm1328_vm6, %v3153_v33, %v3576_v0 }
 0x1d2   : > { %1155 = vrot.lane.b32.xlu0 %v4252_v5, %s2120_s8  ;;  %2040 = vmatprep.mubr.msk.f32.mxu1 %vm1505_vm11, %v1481_v14  ;;  %v730_v14 = vsel %vm273_vm0, %v727_v6, %v729_v51  ;;  %v222_v51 = vld [vmem:[%s2155_s17 + $0x198] sm:$0xff] }
 0x1d3   : > { %v877_v12 = vpop.permute.xlu1 %876 }
 0x1d4   : > { %v845_v61 = vpop.permute.xlu0 %844  ;;  %v1384_v22 = vsel %vm1361_vm7, %v1351_v28, %v877_v12 }
 0x1d5   : > { %890 = vrot.lane.b32.xlu1 %v4251_v34, %s2117_s22  ;;  %v1368_v13 = vsel %vm1361_vm7, %v1335_v18, %v845_v61  ;;  %v1128_v18 = vrot.slane %v222_v51, 2 }
 0x1d6   : > { %858 = vrot.lane.b32.xlu0 %v4252_v5, %s2117_s22  ;;  %v4257_v5 = vld [vmem:[#allocation46_spill] sm:$0xff] }
 0x1d7   : > { %v1176_v56 = vpop.permute.xlu1 %1175 }
 0x1d8   : > { %v1482_v7 = vsel %vm1460_vm10, %v1449_v63, %v1176_v56  ;;  %v1144_v55 = vpop.permute.xlu0 %1143  ;;  %v830_v63 = vrot.slane %v221_v57, 2 }
 0x1d9   : > { %v1466_v21 = vsel %vm1460_vm10, %v1433_v41, %v1144_v55  ;;  %986 = vrot.lane.b32.xlu1 %v4253_v44, %s2118_s23  ;;  %2041 = vmatmul.mubr.msk.f32.gmra.mxu1 %vm1505_vm11, %v1482_v7 }
 0x1da   : > { %954 = vrot.lane.b32.xlu0 %v3353_v59, %s2118_s23  ;;  %2017 = vmatmul.mubr.msk.f32.gmra.mxu0 %vm1505_vm11, %v1466_v21 }
 0x1db   : > { %v879_v4 = vpop.permute.xlu1 %878 }
 0x1dc   : > { %v847_v16 = vpop.permute.xlu0 %846 }
 0x1dd   : > { %988 = vrot.lane.b32.xlu1 %v4254_v15, %s2118_s23 }
 0x1de   : > { %956 = vrot.lane.b32.xlu0 %v3379_v9, %s2118_s23  ;;  %v828_v9 = vrot.slane %v4254_v15, 2 }
 0x1df   : > { %v975_v52 = vpop.permute.xlu1 %974 }
 0x1e0   : > { %v943_v47 = vpop.permute.xlu0 %942  ;;  %v829_v58 = vsel %vm450_vm1, %v827_v32, %v828_v9  ;;  %v831_v61 = vsel %vm450_vm1, %v828_v9, %v830_v63  ;;  %v1417_v21 = vsel %vm1394_vm8, %v1384_v22, %v975_v52  ;;  %v1336_v52 = vsel %vm1328_vm6, %v3017_v2, %v3266_v26  ;;  %v223_v9 = vld [vmem:[%s2155_s17 + $0x1a0] sm:$0xff]  ;;  %v4261_v22 = vld [vmem:[#allocation48_spill] sm:$0xff] }
 0x1e1   : > { %1088 = vrot.lane.b32.xlu1 %v728_v48, %s2119_s28  ;;  %v1401_v20 = vsel %vm1394_vm8, %v1368_v13, %v943_v47  ;;  %v1385_v47 = vsel %vm1361_vm7, %v1352_v31, %v879_v4  ;;  %v1369_v57 = vsel %vm1361_vm7, %v1336_v52, %v847_v16  ;;  %v4259_v13 = vld [vmem:[#allocation14_spill] sm:$0xff]  ;;  %v4262_v31 = vld [vmem:[#allocation47_spill] sm:$0xff] }
 0x1e2   : > { %1056 = vrot.lane.b32.xlu0 %v4255_v60, %s2119_s28 }
 0x1e3   : > { %v977_v59 = vpop.permute.xlu1 %976 }
 0x1e4   : > { %v945_v24 = vpop.permute.xlu0 %944  ;;  %v1418_v60 = vsel %vm1394_vm8, %v1385_v47, %v977_v59  ;;  %v1027_v59 = vrot.slane %v222_v51, 1 }
 0x1e5   : > { %1058 = vrot.lane.b32.xlu1 %v4256_v49, %s2119_s28  ;;  %v1402_v33 = vsel %vm1394_vm8, %v1369_v57, %v945_v24  ;;  %v1028_v24 = vrot.slane %v223_v9, 1 }
 0x1e6   : > { %791 = vrot.lane.b32.xlu0 %v728_v48, %s2116_s21 }
 0x1e7   : > { %v1077_v3 = vpop.permute.xlu1 %1076 }
 0x1e8   : > { %v1045_v34 = vpop.permute.xlu0 %1044  ;;  %v1450_v15 = vsel %vm1427_vm9, %v1417_v21, %v1077_v3  ;;  %v224_v3 = vld [vmem:[%s2155_s17 + $0x1a8] sm:$0x3] }
 0x1e9   : > { %1157 = vrot.lane.b32.xlu1 %v4257_v5, %s2120_s8  ;;  %v1434_v56 = vsel %vm1427_vm9, %v1401_v20, %v1045_v34  ;;  %v1029_v34 = vsel %vm273_vm0, %v1027_v59, %v1028_v24 }
 0x1ea   : > { %1090 = vrot.lane.b32.xlu0 %v730_v14, %s2119_s28 }
 0x1eb   : > { %v1047_v54 = vpop.permute.xlu1 %1046 }
 0x1ec   : > { %v3633_v29 = vpop.permute.xlu0 %779  ;;  %v1435_v2 = vsel %vm1427_vm9, %v1402_v33, %v1047_v54 }
 0x1ed   : > { %793 = vrot.lane.b32.xlu1 %v730_v14, %s2116_s21 }
 0x1ee   : > { %1189 = vrot.lane.b32.xlu0 %v829_v58, %s2120_s8 }
 0x1ef   : > { %v1146_v41 = vpop.permute.xlu1 %1145 }
 0x1f0   : > { %v1467_v7 = vsel %vm1460_vm10, %v1434_v56, %v1146_v41  ;;  %v1079_v55 = vpop.permute.xlu0 %1078 }
 0x1f1   : > { %892 = vrot.lane.b32.xlu1 %v829_v58, %s2117_s22  ;;  %2019 = vmatprep.mubr.msk.f32.mxu0 %vm1505_vm11, %v1467_v7  ;;  %v1451_v0 = vsel %vm1427_vm9, %v1418_v60, %v1079_v55  ;;  %v1131_v7 = vrot.slane %v224_v3, 2 }
 0x1f2   : > { %860 = vrot.lane.b32.xlu0 %v4257_v5, %s2117_s22  ;;  %v1030_v5 = vrot.slane %v224_v3, 1 }
 0x1f3   : > { %v3651_v44 = vpop.permute.xlu1 %781 }
 0x1f4   : > { %v1178_v6 = vpop.permute.xlu0 %1177  ;;  %v1031_v20 = vsel %vm273_vm0, %v1028_v24, %v1030_v5 }
 0x1f5   : > { %v1483_v53 = vsel %vm1460_vm10, %v1450_v15, %v1178_v6  ;;  %1191 = vrot.lane.b32.xlu1 %v831_v61, %s2120_s8  ;;  %v1337_v15 = vsel %vm1328_vm6, %v3040_v30, %v3276_v27  ;;  %v1353_v30 = vsel %vm1328_vm6, %v3176_v40, %v3633_v29  ;;  %v1354_v40 = vsel %vm1328_vm6, %v3173_v45, %v3651_v44 }
 0x1f6   : > { %1159 = vrot.lane.b32.xlu0 %v4258_v42, %s2120_s8  ;;  %2043 = vmatprep.mubr.msk.f32.mxu1 %vm1505_vm11, %v1483_v53 }
 0x1f7   : > { %v3659_v12 = vpop.permute.xlu1 %880 }
 0x1f8   : > { %v849_v48 = vpop.permute.xlu0 %848  ;;  %v1386_v27 = vsel %vm1361_vm7, %v1353_v30, %v3659_v12  ;;  %v1338_v12 = vsel %vm1328_vm6, %v3037_v11, %v3274_v25 }
 0x1f9   : > { %894 = vrot.lane.b32.xlu1 %v831_v61, %s2117_s22  ;;  %v1370_v53 = vsel %vm1361_vm7, %v1337_v15, %v849_v48 }
 0x1fa   : > { %862 = vrot.lane.b32.xlu0 %v4258_v42, %s2117_s22 }
 0x1fb   : > { %v1180_v49 = vpop.permute.xlu1 %1179 }
 0x1fc   : > { %v1484_v26 = vsel %vm1460_vm10, %v1451_v0, %v1180_v49  ;;  %v1148_v4 = vpop.permute.xlu0 %1147 }
 0x1fd   : > { %v1468_v16 = vsel %vm1460_vm10, %v1435_v2, %v1148_v4  ;;  %990 = vrot.lane.b32.xlu1 %v222_v51, %s2118_s23  ;;  %2044 = vmatmul.mubr.msk.f32.gmra.mxu1 %vm1505_vm11, %v1484_v26 }
 0x1fe   : > { %958 = vrot.lane.b32.xlu0 %v3463_v43, %s2118_s23  ;;  %2020 = vmatmul.mubr.msk.f32.gmra.mxu0 %vm1505_vm11, %v1468_v16  ;;  %v1129_v43 = vrot.slane %v223_v9, 2 }
 0x1ff   : > { %v883_v32 = vpop.permute.xlu1 %882 }
 0x200   : > { %v851_v14 = vpop.permute.xlu0 %850  ;;  %v1130_v41 = vsel %vm450_vm1, %v1128_v18, %v1129_v43  ;;  %v1132_v61 = vsel %vm450_vm1, %v1129_v43, %v1131_v7  ;;  %v1387_v2 = vsel %vm1361_vm7, %v1354_v40, %v883_v32 }
 0x201   : > { %992 = vrot.lane.b32.xlu1 %v223_v9, %s2118_s23  ;;  %v1371_v26 = vsel %vm1361_vm7, %v1338_v12, %v851_v14 }
 0x202   : > { %960 = vrot.lane.b32.xlu0 %v3491_v8, %s2118_s23  ;;  %v4260_v8 = vld [vmem:[#allocation13_spill] sm:$0xff] }
 0x203   : > { %v979_v54 = vpop.permute.xlu1 %978 }
 0x204   : > { %v947_v58 = vpop.permute.xlu0 %946  ;;  %v1419_v48 = vsel %vm1394_vm8, %v1386_v27, %v979_v54 }
 0x205   : > { %1092 = vrot.lane.b32.xlu1 %v1029_v34, %s2119_s28  ;;  %v1403_v42 = vsel %vm1394_vm8, %v1370_v53, %v947_v58 }
 0x206   : > { %1060 = vrot.lane.b32.xlu0 %v4259_v13, %s2119_s28  ;;  %v1339_v13 = vsel %vm1328_vm6, %v3060_v38, %v3284_v37 }
 0x207   : > { %v981_v63 = vpop.permute.xlu1 %980 }
 0x208   : > { %v949_v56 = vpop.permute.xlu0 %948  ;;  %v1420_v4 = vsel %vm1394_vm8, %v1387_v2, %v981_v63 }
 0x209   : > { %1094 = vrot.lane.b32.xlu1 %v1031_v20, %s2119_s28  ;;  %v1404_v16 = vsel %vm1394_vm8, %v1371_v26, %v949_v56 }
 0x20a   : > { %1062 = vrot.lane.b32.xlu0 %v4260_v8, %s2119_s28 }
 0x20b   : > { %v1081_v55 = vpop.permute.xlu1 %1080 }
 0x20c   : > { %v1049_v28 = vpop.permute.xlu0 %1048  ;;  %v1452_v33 = vsel %vm1427_vm9, %v1419_v48, %v1081_v55 }
 0x20d   : > { %1193 = vrot.lane.b32.xlu1 %v1130_v41, %s2120_s8  ;;  %v1436_v52 = vsel %vm1427_vm9, %v1403_v42, %v1049_v28 }
 0x20e   : > { %1161 = vrot.lane.b32.xlu0 %v4261_v22, %s2120_s8 }
 0x20f   : > { %v1051_v21 = vpop.permute.xlu1 %1050 }
 0x210   : > { %v784_v6 = vpop.permute.xlu0 %783  ;;  %v1437_v3 = vsel %vm1427_vm9, %v1404_v16, %v1051_v21 }
 0x211   : > { %1195 = vrot.lane.b32.xlu1 %v1132_v61, %s2120_s8  ;;  %v1355_v28 = vsel %vm1328_vm6, %v3196_v23, %v784_v6  ;;  %v1340_v6 = vsel %vm1328_vm6, %v3057_v35, %v3282_v36 }
 0x212   : > { %1163 = vrot.lane.b32.xlu0 %v4262_v31, %s2120_s8 }
 0x213   : > { %v1150_v47 = vpop.permute.xlu1 %1149 }
 0x214   : > { %v1469_v57 = vsel %vm1460_vm10, %v1436_v52, %v1150_v47  ;;  %v1083_v60 = vpop.permute.xlu0 %1082 }
 0x215   : > { %2022 = vmatprep.mubr.msk.f32.mxu0 %vm1505_vm11, %v1469_v57  ;;  %v1453_v59 = vsel %vm1427_vm9, %v1420_v4, %v1083_v60 }
 0x217   : > { %v786_v51 = vpop.permute.xlu1 %785 }
 0x218   : > { %v1182_v0 = vpop.permute.xlu0 %1181  ;;  %v1356_v42 = vsel %vm1328_vm6, %v3193_v1, %v786_v51 }
 0x219   : > { %v1485_v49 = vsel %vm1460_vm10, %v1452_v33, %v1182_v0 }
 0x21a   : > { %2046 = vmatprep.mubr.msk.f32.mxu1 %vm1505_vm11, %v1485_v49 }
 0x21b   : > { %v885_v9 = vpop.permute.xlu1 %884 }
 0x21c   : > { %v853_v29 = vpop.permute.xlu0 %852  ;;  %v1388_v22 = vsel %vm1361_vm7, %v1355_v28, %v885_v9  ;;  %v3776_v9 = vld [vmem:[%s3946_s2] ss:$0 sm:$0xff] }
 0x21d   : > { %v1372_v63 = vsel %vm1361_vm7, %v1339_v13, %v853_v29 }
 0x21f   : > { %v1184_v24 = vpop.permute.xlu1 %1183 }
 0x220   : > { %v1486_v45 = vsel %vm1460_vm10, %v1453_v59, %v1184_v24  ;;  %v1152_v44 = vpop.permute.xlu0 %1151 }
 0x221   : > { %v1470_v34 = vsel %vm1460_vm10, %v1437_v3, %v1152_v44  ;;  %2047 = vmatmul.mubr.msk.f32.gmra.mxu1 %vm1505_vm11, %v1486_v45 }
 0x222   : > { %2023 = vmatmul.mubr.msk.f32.gmra.mxu0 %vm1505_vm11, %v1470_v34  ;;  %v1341_v34 = vsel %vm1328_vm6, %v3080_v46, %v3292_v39 }
 0x223   : > { %v887_v11 = vpop.permute.xlu1 %886 }
 0x224   : > { %v855_v25 = vpop.permute.xlu0 %854  ;;  %v1389_v31 = vsel %vm1361_vm7, %v1356_v42, %v887_v11 }
 0x225   : > { %v1373_v52 = vsel %vm1361_vm7, %v1340_v6, %v855_v25 }
 0x227   : > { %v983_v32 = vpop.permute.xlu1 %982 }
 0x228   : > { %v951_v14 = vpop.permute.xlu0 %950  ;;  %v1421_v38 = vsel %vm1394_vm8, %v1388_v22, %v983_v32 }
 0x229   : > { %v1405_v56 = vsel %vm1394_vm8, %v1372_v63, %v951_v14 }
 0x22b   : > { %v985_v5 = vpop.permute.xlu1 %984 }
 0x22c   : > { %v953_v54 = vpop.permute.xlu0 %952  ;;  %v1422_v47 = vsel %vm1394_vm8, %v1389_v31, %v985_v5 }
 0x22d   : > { %v1406_v57 = vsel %vm1394_vm8, %v1373_v52, %v953_v54 }
 0x22f   : > { %v1085_v58 = vpop.permute.xlu1 %1084 }
 0x230   : > { %v1053_v18 = vpop.permute.xlu0 %1052  ;;  %v1454_v61 = vsel %vm1427_vm9, %v1421_v38, %v1085_v58 }
 0x231   : > { %v1438_v8 = vsel %vm1427_vm9, %v1405_v56, %v1053_v18 }
 0x233   : > { %v1055_v43 = vpop.permute.xlu1 %1054 }
 0x234   : > { %v3741_v20 = vpop.permute.xlu0 %787  ;;  %v1439_v27 = vsel %vm1427_vm9, %v1406_v57, %v1055_v43 }
 0x235   : > { %v1357_v18 = vsel %vm1328_vm6, %v3216_v10, %v3741_v20  ;;  %v1342_v20 = vsel %vm1328_vm6, %v3077_v19, %v3290_v17 }
 0x237   : > { %v1154_v41 = vpop.permute.xlu1 %1153 }
 0x238   : > { %v1471_v7 = vsel %vm1460_vm10, %v1438_v8, %v1154_v41  ;;  %v1087_v55 = vpop.permute.xlu0 %1086 }
 0x239   : > { %2025 = vmatprep.mubr.msk.f32.mxu0 %vm1505_vm11, %v1471_v7  ;;  %v1455_v60 = vsel %vm1427_vm9, %v1422_v47, %v1087_v55 }
 0x23b   : > { %v3752_v37 = vpop.permute.xlu1 %789 }
 0x23c   : > { %v1186_v21 = vpop.permute.xlu0 %1185  ;;  %v1358_v41 = vsel %vm1328_vm6, %v3213_v50, %v3752_v37 }
 0x23d   : > { %v1487_v15 = vsel %vm1460_vm10, %v1454_v61, %v1186_v21 }
 0x23e   : > { %2049 = vmatprep.mubr.msk.f32.mxu1 %vm1505_vm11, %v1487_v15 }
 0x23f   : > { %v889_v53 = vpop.permute.xlu1 %888 }
 0x240   : > { %v857_v23 = vpop.permute.xlu0 %856  ;;  %v1390_v43 = vsel %vm1361_vm7, %v1357_v18, %v889_v53 }
 0x241   : > { %v1374_v25 = vsel %vm1361_vm7, %v1341_v34, %v857_v23  ;;  %v4267_v34 = vld [vmem:[#allocation15_spill] sm:$0xff] }
 0x243   : > { %v1188_v30 = vpop.permute.xlu1 %1187 }
 0x244   : > { %v1488_v1 = vsel %vm1460_vm10, %v1455_v60, %v1188_v30  ;;  %v1156_v48 = vpop.permute.xlu0 %1155 }
 0x245   : > { %v1472_v51 = vsel %vm1460_vm10, %v1439_v27, %v1156_v48  ;;  %2050 = vmatmul.mubr.msk.f32.gmra.mxu1 %vm1505_vm11, %v1488_v1 }
 0x246   : > { %2026 = vmatmul.mubr.msk.f32.gmra.mxu0 %vm1505_vm11, %v1472_v51 }
 0x247   : > { %v891_v35 = vpop.permute.xlu1 %890 }
 0x248   : > { %v859_v36 = vpop.permute.xlu0 %858  ;;  %v1391_v7 = vsel %vm1361_vm7, %v1358_v41, %v891_v35 }
 0x249   : > { %v1375_v55 = vsel %vm1361_vm7, %v1342_v20, %v859_v36 }
 0x24b   : > { %v987_v33 = vpop.permute.xlu1 %986 }
 0x24c   : > { %v955_v0 = vpop.permute.xlu0 %954  ;;  %v1423_v46 = vsel %vm1394_vm8, %v1390_v43, %v987_v33 }
 0x24d   : > { %v1407_v32 = vsel %vm1394_vm8, %v1374_v25, %v955_v0  ;;  %v4263_v0 = vld [vmem:[#allocation68_spill] sm:$0xff] }
 0x24f   : > { %v989_v49 = vpop.permute.xlu1 %988 }
 0x250   : > { %v957_v40 = vpop.permute.xlu0 %956  ;;  %v1424_v28 = vsel %vm1394_vm8, %v1391_v7, %v989_v49  ;;  %v4264_v49 = vld [vmem:[#allocation93_spill] sm:$0xff] }
 0x251   : > { %v2036_v29 = vpop.f32.mrf.mxu1  ;;  %v1408_v22 = vsel %vm1394_vm8, %v1375_v55, %v957_v40  ;;  %v1343_v40 = vsel %vm1328_vm6, %v4264_v49, %v4263_v0 }
 0x252   : > { %v2012_v12 = vpop.f32.mrf.mxu0  ;;  %v1758_v2 = vadd.f32 %v2036_v29, %v3776_v9 }
 0x253   : > { %v1678_v26 = vadd.f32 %v2012_v12, %v3776_v9  ;;  %v1089_v4 = vpop.permute.xlu1 %1088  ;;  %v1752_v16 = vpop.f32.mrf.mxu1 }
 0x254   : > { %1848 = vst.msk [vmem:[%s3781_s16 + $0x88] sm:$0xff] %vm1262_vm4, %v1758_v2  ;;  %v1672_v59 = vpop.f32.mrf.mxu0  ;;  %v1753_v24 = vadd.f32 %v3776_v9, %v1752_v16  ;;  %v1057_v3 = vpop.permute.xlu0 %1056  ;;  %v1456_v13 = vsel %vm1427_vm9, %v1423_v46, %v1089_v4 }
 0x255   : > { %1832 = vst.msk [vmem:[%s3781_s16 + $0x8] sm:$0xff] %vm1262_vm4, %v1678_v26  ;;  %v1673_v45 = vadd.f32 %v3776_v9, %v1672_v59  ;;  %v1440_v14 = vsel %vm1427_vm9, %v1407_v32, %v1057_v3  ;;  %v4265_v59 = vld [vmem:[#allocation20_spill] sm:$0xff] }
 0x256   : > { %1847 = vst.msk [vmem:[%s3781_s16 + $0x80] sm:$0xff] %vm1262_vm4, %v1753_v24 }
 0x257   : > { %1831 = vst.msk [vmem:[%s3781_s16] sm:$0xff] %vm1262_vm4, %v1673_v45  ;;  %v1059_v44 = vpop.permute.xlu1 %1058 }
 0x258   : > { %v792_v11 = vpop.permute.xlu0 %791  ;;  %v1441_v21 = vsel %vm1427_vm9, %v1408_v22, %v1059_v44  ;;  %v4266_v44 = vld [vmem:[#allocation67_spill] sm:$0xff] }
 0x259   : > { %v1359_v36 = vsel %vm1328_vm6, %v3236_v62, %v792_v11  ;;  %v1344_v11 = vsel %vm1328_vm6, %v4267_v34, %v4266_v44 }
 0x25b   : > { %v1158_v5 = vpop.permute.xlu1 %1157 }
 0x25c   : > { %v1473_v54 = vsel %vm1460_vm10, %v1440_v14, %v1158_v5  ;;  %v1091_v58 = vpop.permute.xlu0 %1090 }
 0x25d   : > { %2028 = vmatprep.mubr.msk.f32.mxu0 %vm1505_vm11, %v1473_v54  ;;  %v1457_v38 = vsel %vm1427_vm9, %v1424_v28, %v1091_v58 }
 0x25f   : > { %v794_v39 = vpop.permute.xlu1 %793 }
 0x260   : > { %v1190_v63 = vpop.permute.xlu0 %1189  ;;  %v1360_v24 = vsel %vm1328_vm6, %v4265_v59, %v794_v39 }
 0x261   : > { %v1489_v56 = vsel %vm1460_vm10, %v1456_v13, %v1190_v63 }
 0x262   : > { %2052 = vmatprep.mubr.msk.f32.mxu1 %vm1505_vm11, %v1489_v56 }
 0x263   : > { %v893_v8 = vpop.permute.xlu1 %892 }
 0x264   : > { %v861_v10 = vpop.permute.xlu0 %860  ;;  %v1392_v29 = vsel %vm1361_vm7, %v1359_v36, %v893_v8 }
 0x265   : > { %v1376_v12 = vsel %vm1361_vm7, %v1343_v40, %v861_v10 }
 0x267   : > { %v1192_v61 = vpop.permute.xlu1 %1191 }
 0x268   : > { %v1490_v50 = vsel %vm1460_vm10, %v1457_v38, %v1192_v61  ;;  %v1160_v37 = vpop.permute.xlu0 %1159 }
 0x269   : > { %v1474_v15 = vsel %vm1460_vm10, %v1441_v21, %v1160_v37  ;;  %2053 = vmatmul.mubr.msk.f32.gmra.mxu1 %vm1505_vm11, %v1490_v50 }
 0x26a   : > { %2029 = vmatmul.mubr.msk.f32.gmra.mxu0 %vm1505_vm11, %v1474_v15 }
 0x26b   : > { %v895_v19 = vpop.permute.xlu1 %894 }
 0x26c   : > { %v863_v17 = vpop.permute.xlu0 %862  ;;  %v1393_v25 = vsel %vm1361_vm7, %v1360_v24, %v895_v19 }
 0x26d   : > { %v1377_v14 = vsel %vm1361_vm7, %v1344_v11, %v863_v17 }
 0x26f   : > { %v991_v53 = vpop.permute.xlu1 %990 }
 0x270   : > { %v959_v42 = vpop.permute.xlu0 %958  ;;  %v1425_v2 = vsel %vm1394_vm8, %v1392_v29, %v991_v53 }
 0x271   : > { %v1409_v26 = vsel %vm1394_vm8, %v1376_v12, %v959_v42 }
 0x273   : > { %v993_v23 = vpop.permute.xlu1 %992 }
 0x274   : > { %v961_v6 = vpop.permute.xlu0 %960  ;;  %v1426_v5 = vsel %vm1394_vm8, %v1393_v25, %v993_v23 }
 0x275   : > { %v2039_v31 = vpop.f32.mrf.mxu1  ;;  %v1410_v54 = vsel %vm1394_vm8, %v1377_v14, %v961_v6 }
 0x276   : > { %v2015_v52 = vpop.f32.mrf.mxu0  ;;  %v1768_v47 = vadd.f32 %v2039_v31, %v3776_v9 }
 0x277   : > { %v1688_v57 = vadd.f32 %v2015_v52, %v3776_v9  ;;  %v1093_v60 = vpop.permute.xlu1 %1092  ;;  %v1762_v30 = vpop.f32.mrf.mxu1 }
 0x278   : > { %1850 = vst.msk [vmem:[%s3781_s16 + $0x98] sm:$0xff] %vm1262_vm4, %v1768_v47  ;;  %v1682_v27 = vpop.f32.mrf.mxu0  ;;  %v1763_v1 = vadd.f32 %v3776_v9, %v1762_v30  ;;  %v1061_v48 = vpop.permute.xlu0 %1060  ;;  %v1458_v4 = vsel %vm1427_vm9, %v1425_v2, %v1093_v60 }
 0x279   : > { %1834 = vst.msk [vmem:[%s3781_s16 + $0x18] sm:$0xff] %vm1262_vm4, %v1688_v57  ;;  %v1683_v51 = vadd.f32 %v3776_v9, %v1682_v27  ;;  %v1442_v62 = vsel %vm1427_vm9, %v1409_v26, %v1061_v48 }
 0x27a   : > { %1849 = vst.msk [vmem:[%s3781_s16 + $0x90] sm:$0xff] %vm1262_vm4, %v1763_v1 }
 0x27b   : > { %1833 = vst.msk [vmem:[%s3781_s16 + $0x10] sm:$0xff] %vm1262_vm4, %v1683_v51  ;;  %v1095_v35 = vpop.permute.xlu1 %1094 }
 0x27c   : > { %v1063_v33 = vpop.permute.xlu0 %1062  ;;  %v1459_v58 = vsel %vm1427_vm9, %v1426_v5, %v1095_v35 }
 0x27d   : > { %v1443_v43 = vsel %vm1427_vm9, %v1410_v54, %v1063_v33 }
 0x27f   : > { %v1194_v16 = vpop.permute.xlu1 %1193 }
 0x280   : > { %v1491_v3 = vsel %vm1460_vm10, %v1458_v4, %v1194_v16  ;;  %v1162_v45 = vpop.permute.xlu0 %1161 }
 0x281   : > { %v1475_v32 = vsel %vm1460_vm10, %v1442_v62, %v1162_v45  ;;  %2055 = vmatprep.mubr.msk.f32.mxu1 %vm1505_vm11, %v1491_v3 }
 0x282   : > { %2031 = vmatprep.mubr.msk.f32.mxu0 %vm1505_vm11, %v1475_v32 }
 0x283   : > { %v1196_v18 = vpop.permute.xlu1 %1195 }
 0x284   : > { %v1492_v46 = vsel %vm1460_vm10, %v1459_v58, %v1196_v18  ;;  %v1164_v39 = vpop.permute.xlu0 %1163 }
 0x285   : > { %v1476_v13 = vsel %vm1460_vm10, %v1443_v43, %v1164_v39  ;;  %2056 = vmatmul.mubr.msk.f32.gmra.mxu1 %vm1505_vm11, %v1492_v46 }
 0x286   : > { %2032 = vmatmul.mubr.msk.f32.gmra.mxu0 %vm1505_vm11, %v1476_v13 }
 0x299   : > { %v2042_v63 = vpop.f32.mrf.mxu1 }
 0x29a   : > { %v2018_v56 = vpop.f32.mrf.mxu0  ;;  %v1778_v8 = vadd.f32 %v2042_v63, %v3776_v9 }
 0x29b   : > { %v1698_v41 = vadd.f32 %v2018_v56, %v3776_v9  ;;  %v1772_v10 = vpop.f32.mrf.mxu1 }
 0x29c   : > { %1852 = vst.msk [vmem:[%s3781_s16 + $0xa8] sm:$0xff] %vm1262_vm4, %v1778_v8  ;;  %v1692_v20 = vpop.f32.mrf.mxu0  ;;  %v1773_v7 = vadd.f32 %v3776_v9, %v1772_v10 }
 0x29d   : > { %1836 = vst.msk [vmem:[%s3781_s16 + $0x28] sm:$0xff] %vm1262_vm4, %v1698_v41  ;;  %v1693_v55 = vadd.f32 %v3776_v9, %v1692_v20 }
 0x29e   : > { %1851 = vst.msk [vmem:[%s3781_s16 + $0xa0] sm:$0xff] %vm1262_vm4, %v1773_v7 }
 0x29f   : > { %1835 = vst.msk [vmem:[%s3781_s16 + $0x20] sm:$0xff] %vm1262_vm4, %v1693_v55 }
 0x2bd   : > { %v2045_v28 = vpop.f32.mrf.mxu1 }
 0x2be   : > { %v2021_v22 = vpop.f32.mrf.mxu0  ;;  %v1788_v38 = vadd.f32 %v2045_v28, %v3776_v9 }
 0x2bf   : > { %v1708_v61 = vadd.f32 %v2021_v22, %v3776_v9  ;;  %v1782_v21 = vpop.f32.mrf.mxu1 }
 0x2c0   : > { %1854 = vst.msk [vmem:[%s3781_s16 + $0xb8] sm:$0xff] %vm1262_vm4, %v1788_v38  ;;  %v1702_v50 = vpop.f32.mrf.mxu0  ;;  %v1783_v37 = vadd.f32 %v3776_v9, %v1782_v21 }
 0x2c1   : > { %1838 = vst.msk [vmem:[%s3781_s16 + $0x38] sm:$0xff] %vm1262_vm4, %v1708_v61  ;;  %v1703_v15 = vadd.f32 %v3776_v9, %v1702_v50 }
 0x2c2   : > { %1853 = vst.msk [vmem:[%s3781_s16 + $0xb0] sm:$0xff] %vm1262_vm4, %v1783_v37 }
 0x2c3   : > { %1837 = vst.msk [vmem:[%s3781_s16 + $0x30] sm:$0xff] %vm1262_vm4, %v1703_v15 }
 0x2e1   : > { %v2048_v19 = vpop.f32.mrf.mxu1 }
 0x2e2   : > { %v2024_v17 = vpop.f32.mrf.mxu0  ;;  %v1798_v53 = vadd.f32 %v2048_v19, %v3776_v9 }
 0x2e3   : > { %v1718_v42 = vadd.f32 %v2024_v17, %v3776_v9  ;;  %v1792_v23 = vpop.f32.mrf.mxu1 }
 0x2e4   : > { %1856 = vst.msk [vmem:[%s3781_s16 + $0xc8] sm:$0xff] %vm1262_vm4, %v1798_v53  ;;  %v1712_v6 = vpop.f32.mrf.mxu0  ;;  %v1793_v31 = vadd.f32 %v3776_v9, %v1792_v23 }
 0x2e5   : > { %1840 = vst.msk [vmem:[%s3781_s16 + $0x48] sm:$0xff] %vm1262_vm4, %v1718_v42  ;;  %v1713_v52 = vadd.f32 %v3776_v9, %v1712_v6 }
 0x2e6   : > { %1855 = vst.msk [vmem:[%s3781_s16 + $0xc0] sm:$0xff] %vm1262_vm4, %v1793_v31 }
 0x2e7   : > { %1839 = vst.msk [vmem:[%s3781_s16 + $0x40] sm:$0xff] %vm1262_vm4, %v1713_v52 }
 0x305   : > { %v2051_v47 = vpop.f32.mrf.mxu1 }
 0x306   : > { %v2027_v57 = vpop.f32.mrf.mxu0  ;;  %v1808_v60 = vadd.f32 %v2051_v47, %v3776_v9 }
 0x307   : > { %v1728_v30 = vadd.f32 %v2027_v57, %v3776_v9  ;;  %v1802_v27 = vpop.f32.mrf.mxu1 }
 0x308   : > { %1858 = vst.msk [vmem:[%s3781_s16 + $0xd8] sm:$0xff] %vm1262_vm4, %v1808_v60  ;;  %v1722_v1 = vpop.f32.mrf.mxu0  ;;  %v1803_v48 = vadd.f32 %v3776_v9, %v1802_v27 }
 0x309   : > { %1842 = vst.msk [vmem:[%s3781_s16 + $0x58] sm:$0xff] %vm1262_vm4, %v1728_v30  ;;  %v1723_v51 = vadd.f32 %v3776_v9, %v1722_v1 }
 0x30a   : > { %1857 = vst.msk [vmem:[%s3781_s16 + $0xd0] sm:$0xff] %vm1262_vm4, %v1803_v48 }
 0x30b   : > { %1841 = vst.msk [vmem:[%s3781_s16 + $0x50] sm:$0xff] %vm1262_vm4, %v1723_v51 }
 0x329   : > { %v2054_v35 = vpop.f32.mrf.mxu1 }
 0x32a   : > { %v2030_v36 = vpop.f32.mrf.mxu0  ;;  %v1818_v33 = vadd.f32 %v2054_v35, %v3776_v9 }
 0x32b   : > { %v1738_v0 = vadd.f32 %v2030_v36, %v3776_v9  ;;  %v1812_v49 = vpop.f32.mrf.mxu1 }
 0x32c   : > { %1860 = vst.msk [vmem:[%s3781_s16 + $0xe8] sm:$0xff] %vm1262_vm4, %v1818_v33  ;;  %v1732_v40 = vpop.f32.mrf.mxu0  ;;  %v1813_v29 = vadd.f32 %v3776_v9, %v1812_v49 }
 0x32d   : > { %1844 = vst.msk [vmem:[%s3781_s16 + $0x68] sm:$0xff] %vm1262_vm4, %v1738_v0  ;;  %v1733_v12 = vadd.f32 %v3776_v9, %v1732_v40 }
 0x32e   : > { %1859 = vst.msk [vmem:[%s3781_s16 + $0xe0] sm:$0xff] %vm1262_vm4, %v1813_v29 }
 0x32f   : > { %1843 = vst.msk [vmem:[%s3781_s16 + $0x60] sm:$0xff] %vm1262_vm4, %v1733_v12 }
 0x345   : > { %v2057_v2 = vpop.f32.mrf.mxu1 }
 0x346   : > { %v2033_v26 = vpop.f32.mrf.mxu0  ;;  %v1828_v4 = vadd.f32 %v2057_v2, %v3776_v9 }
 0x347   : > { %v1748_v16 = vadd.f32 %v2033_v26, %v3776_v9  ;;  %v1822_v59 = vpop.f32.mrf.mxu1 }
 0x348   : > { %1862 = vst.msk [vmem:[%s3781_s16 + $0xf8] sm:$0xff] %vm1262_vm4, %v1828_v4  ;;  %v1742_v24 = vpop.f32.mrf.mxu0  ;;  %v1823_v62 = vadd.f32 %v3776_v9, %v1822_v59 }
 0x349   : > { %1846 = vst.msk [vmem:[%s3781_s16 + $0x78] sm:$0xff] %vm1262_vm4, %v1748_v16  ;;  %v1743_v3 = vadd.f32 %v3776_v9, %v1742_v24 }
 0x34a   : > { %1861 = vst.msk [vmem:[%s3781_s16 + $0xf0] sm:$0xff] %vm1262_vm4, %v1823_v62 }
 0x34b   : > { %1845 = vst.msk [vmem:[%s3781_s16 + $0x70] sm:$0xff] %vm1262_vm4, %v1743_v3 }
 0x34c PF: > { %s13_s12 = sadd.s32 1, %s2111_s12  }
 0x34d   : > { %p10_p4 = scmp.ge.s32.totalorder %s13_s12, 4  }
 0x34f   :  { %12 = sbr.rel (!%p10_p4) target bundleno = 1 (0x1), region = 62 }

</bundles_post_ra>
